<compile_context>
chip_gen: v7x
topology: tpu7x:2x2x1
jax: 0.10.0
libtpu: 0.0.40
codegen_flags: <defaults>
</compile_context>

<pallas_src>
import functools

import jax
import jax.numpy as jnp
from jax.experimental import pallas as pl
from jax.experimental.pallas import tpu as pltpu

# config values (config.OBS_RADIUS / config.FOV_DEG are external in the
# original repo; fixed deterministically here).
OBS_RADIUS = 1.0
FOV_DEG = 120.0

_DIMS = [(6, 64), (64, 128), (128, 64), (64, 1)]
_MLP_FLOPS_PER_ROW = 2 * (6 * 64 + 64 * 128 + 128 * 64 + 64 * 8)
_PARAM_BYTES = sum(ci * co * 2 + co * 4 for ci, co in _DIMS)


def _cdiv(a, b):
    return -(-a // b)


def _tpu_generation():
    """(TensorCores per device, bf16-VPU available), from the device kind."""
    try:
        kind = jax.devices()[0].device_kind.lower()
    except Exception:  # pragma: no cover - defensive only
        return 1, True
    if any(t in kind for t in ("v2", "v3", "v4", "v5")):
        return 1, False          # v5e etc.: single grid consumer, no bf16 VALU
    if "7" in kind:
        return 2, True           # v7x: 2 TCs share the "parallel" grid axis
    return 1, True               # v6e / unknown newer: single TC, bf16 VALU


def _choose_tile_m(m, num_tc, cap=4096):
    """Fewest grid steps with <= cap columns per step; step count a multiple
    of the TensorCore count so v7x keeps both cores busy."""
    lanes = 128
    m128 = max(lanes, _cdiv(m, lanes) * lanes)
    steps = max(1, _cdiv(m128, cap))
    steps = _cdiv(steps, num_tc) * num_tc
    return _cdiv(_cdiv(m128, steps), lanes) * lanes


# ---------------------------------------------------------------------------
# Pallas kernel: fused feature preamble + four 1x1 convs (channels-first MLP)
# ---------------------------------------------------------------------------
def _cbf_kernel(x_ref, valid_ref, r_ref, w1_ref, b1_ref, w2_ref, b2_ref,
                w3_ref, b3_ref, w4_ref, b4_ref, o_ref, *,
                obs_radius, bf16_epilogue):
    x4 = x_ref[...]                                   # (4, tile_m) f32
    valid = valid_ref[...] > 0.5                      # (1, tile_m) bool

    x0 = x4[0:1, :]
    x1 = x4[1:2, :]
    # d_norm = sqrt(x0^2 + x1^2 + 2e-4)  (the +1e-4 per squared term, summed)
    d_norm = jnp.sqrt(x0 * x0 + x1 * x1 + 2e-4)       # (1, tile_m)

    # Eye channel: `valid` requires dist > 0, which is never true on the
    # diagonal, so after the where() the eye channel is exactly 0 when valid
    # and the 100.0 sentinel otherwise -> a zeros row suffices (no iota/eye).
    zeros = jnp.zeros_like(d_norm)
    feats = jnp.concatenate([x4, zeros, d_norm - r_ref[...]], axis=0)  # (6, tile_m)
    feats = jnp.where(valid, feats, 100.0)

    # distance mask from the post-where features (matches the torch module)
    f0 = feats[0:1, :]
    f1 = feats[1:2, :]
    dist = jnp.sqrt(f0 * f0 + f1 * f1 + 2e-4)
    mask = (dist <= obs_radius).astype(jnp.float32)   # (1, tile_m)

    def act(h_f32, b_ref):
        if bf16_epilogue:
            # bf16 bias+relu epilogue (v6e/v7x VALUs handle bf16 natively)
            return jnp.maximum(h_f32.astype(jnp.bfloat16) + b_ref[...], 0.0)
        return jnp.maximum(h_f32 + b_ref[...], 0.0).astype(jnp.bfloat16)

    # channel MLP on the MXU: bf16 inputs, f32 accumulation
    h = jnp.dot(w1_ref[...], feats.astype(jnp.bfloat16),
                preferred_element_type=jnp.float32)   # (64, tile_m)
    h = act(h, b1_ref)                                # conv1 + relu
    h = jnp.dot(w2_ref[...], h, preferred_element_type=jnp.float32)
    h = act(h, b2_ref)                                # conv2 + relu
    h = jnp.dot(w3_ref[...], h, preferred_element_type=jnp.float32)
    h = act(h, b3_ref)                                # conv3 + relu
    h = jnp.dot(w4_ref[...], h, preferred_element_type=jnp.float32)  # (8, tile_m)
    out = (h[0:1, :] + b4_ref[...]) * mask            # conv4 (row 0) * mask

    # single packed lane-dense store: row 0 = cbf output, row 1 = mask
    o_ref[...] = jnp.concatenate([out, mask], axis=0)[None]   # (1, 2, tile_m)


def _prep_params(params, bf16_epilogue):
    (w1, b1), (w2, b2), (w3, b3), (w4, b4) = params
    bdt = jnp.bfloat16 if bf16_epilogue else jnp.float32
    # pad W4 (1,64) -> (8,64) with zero rows so the last matmul has full sublanes
    w4p = jnp.zeros((8, w4.shape[1]), jnp.float32).at[0:1, :].set(w4)
    return (w1.astype(jnp.bfloat16), b1.astype(bdt),
            w2.astype(jnp.bfloat16), b2.astype(bdt),
            w3.astype(jnp.bfloat16), b3.astype(bdt),
            w4p.astype(jnp.bfloat16), b4.astype(jnp.float32))


def cbf_mlp_pallas(x_cf, valid, r, params, *, tile_m=None):
    """x_cf: (4, M) f32 pair diffs channels-first, valid: (1, M) f32 {0,1},
    r: scalar.  Returns (out (M,), mask (M,)) f32."""
    M = x_cf.shape[1]
    num_tc, bf16_epi = _tpu_generation()
    if tile_m is None:
        tile_m = _choose_tile_m(M, num_tc)
    num_tiles = _cdiv(M, tile_m)
    m_pad = num_tiles * tile_m

    w1, b1, w2, b2, w3, b3, w4p, b4 = _prep_params(params, bf16_epi)
    r_arr = jnp.reshape(jnp.asarray(r, jnp.float32), (1, 1))

    def full_spec(arr):
        return pl.BlockSpec(arr.shape, lambda i: (0, 0))

    cost = pl.CostEstimate(
        flops=m_pad * _MLP_FLOPS_PER_ROW,
        transcendentals=2 * m_pad,                       # the two sqrts
        bytes_accessed=m_pad * (4 * 4 + 4 + 2 * 4) + _PARAM_BYTES,
    )

    kernel = functools.partial(_cbf_kernel, obs_radius=OBS_RADIUS,
                               bf16_epilogue=bf16_epi)

    packed = pl.pallas_call(
        kernel,
        out_shape=jax.ShapeDtypeStruct((num_tiles, 2, tile_m), jnp.float32),
        grid_spec=pltpu.PrefetchScalarGridSpec(
            num_scalar_prefetch=0,
            grid=(num_tiles,),
            in_specs=[
                pl.BlockSpec((4, tile_m), lambda i: (0, i)),   # pair diffs (lane-dense)
                pl.BlockSpec((1, tile_m), lambda i: (0, i)),   # FOV/radius valid mask
                full_spec(r_arr),
                full_spec(w1), full_spec(b1),
                full_spec(w2), full_spec(b2),
                full_spec(w3), full_spec(b3),
                full_spec(w4p), full_spec(b4),
            ],
            out_specs=pl.BlockSpec((1, 2, tile_m), lambda i: (i, 0, 0)),
        ),
        compiler_params=pltpu.CompilerParams(
            dimension_semantics=("parallel",)),
        cost_estimate=cost,
    )(x_cf, valid, r_arr, w1, b1, w2, b2, w3, b3, w4p, b4)

    # padded ragged-tail columns (if any) are independent and sliced off here.
    out_flat = packed[:, 0, :].reshape(m_pad)[:M]
    mask_flat = packed[:, 1, :].reshape(m_pad)[:M]
    return out_flat, mask_flat


# ---------------------------------------------------------------------------
# Glue: filter_agents (plain JAX, small NxN elementwise) + forward wrapper
# ---------------------------------------------------------------------------
def filter_agents(states, r_danger, fov_degrees):
    half_fov = fov_degrees * (jnp.pi / 180.0) / 2.0
    cos_half_fov = jnp.cos(half_fov)
    positions = states[:, :2]
    velocities = states[:, 2:]
    pos_diff = positions[:, None, :] - positions[None, :, :]          # (N,N,2)
    dists = jnp.linalg.norm(pos_diff, axis=2)                          # (N,N)
    within_radius_mask = (dists < r_danger) & (dists > 0)
    vnorm = jnp.linalg.norm(velocities, axis=1, keepdims=True)
    # explicit zero-velocity guard (original relies on NaN comparisons)
    norm_velocities = velocities / jnp.maximum(vnorm, 1e-12)
    norm_pos_diff = pos_diff / (
        jnp.linalg.norm(pos_diff, axis=2, keepdims=True) + 1e-6)
    dot_products = jnp.sum(norm_velocities[:, None, :] * norm_pos_diff, axis=2)
    # acos(clip(dot)) < half_fov  <=>  dot > cos(half_fov)  (no arccos pass)
    within_fov_mask = dot_products > cos_half_fov
    return within_radius_mask & within_fov_mask


def network_cbf_forward(s, x, r, params):
    """Mirrors NetworkCBF.forward. s: (N,4), x: (N,N,4), r: scalar."""
    N = x.shape[0]
    M = N * N
    x_cf = jnp.transpose(x.reshape(M, 4)).astype(jnp.float32)        # (4, M)
    valid = filter_agents(s, OBS_RADIUS, FOV_DEG).reshape(1, M).astype(jnp.float32)
    out_flat, mask_flat = cbf_mlp_pallas(x_cf, valid, r, params)
    return out_flat.reshape(N, N, 1), mask_flat.reshape(N, N, 1)


# ---------------------------------------------------------------------------
# Pure-JAX reference of the full forward (literal port, same bf16 cast points)
# ---------------------------------------------------------------------------
def _ref_forward(s, x, r, params, bf16_epilogue):
    N = x.shape[0]
    M = N * N
    xf = x.reshape(M, 4).astype(jnp.float32)
    d_norm = jnp.sqrt(xf[:, 0] ** 2 + xf[:, 1] ** 2 + 2e-4)
    eye = jnp.eye(N, dtype=jnp.float32).reshape(M)
    feats = jnp.stack([xf[:, 0], xf[:, 1], xf[:, 2], xf[:, 3],
                       eye, d_norm - r], axis=0)                      # (6, M)
    valid = filter_agents(s, OBS_RADIUS, FOV_DEG).reshape(M)
    feats = jnp.where(valid[None, :], feats, 100.0)
    dist = jnp.sqrt(feats[0] ** 2 + feats[1] ** 2 + 2e-4)
    mask = (dist <= OBS_RADIUS).astype(jnp.float32)

    (w1, b1), (w2, b2), (w3, b3), (w4, b4) = params

    def layer(h_bf16, w, b, relu):
        y = jnp.dot(w.astype(jnp.bfloat16), h_bf16,
                    preferred_element_type=jnp.float32)
        if not relu:
            return y + b
        if bf16_epilogue:
            return jnp.maximum(y.astype(jnp.bfloat16) + b.astype(jnp.bfloat16), 0.0)
        return jnp.maximum(y + b, 0.0).astype(jnp.bfloat16)

    h = layer(feats.astype(jnp.bfloat16), w1, b1, True)
    h = layer(h, w2, b2, True)
    h = layer(h, w3, b3, True)
    out = layer(h, w4, b4, False)                                     # (1, M) f32
    out = out * mask[None]
    return out.reshape(N, N, 1), mask.reshape(N, N, 1)


# ---------------------------------------------------------------------------
# Deterministic parameter init (Conv1d(in, out, 1) -> W (out, in), b (out, 1))
# ---------------------------------------------------------------------------
def init_params(key):
    params = []
    keys = jax.random.split(key, 2 * len(_DIMS))
    for idx, (fan_in, fan_out) in enumerate(_DIMS):
        bound = 1.0 / (fan_in ** 0.5)
        w = jax.random.uniform(keys[2 * idx], (fan_out, fan_in),
                               jnp.float32, -bound, bound)
        b = jax.random.uniform(keys[2 * idx + 1], (fan_out, 1),
                               jnp.float32, -bound, bound)
        params.append((w, b))
    return params


if __name__ == "__main__":
    key = jax.random.PRNGKey(0)
    k_p, k_s = jax.random.split(key)

    N = 32                      # agents -> M = N*N = 1024 pair columns
    params = init_params(k_p)

    # s: agent states (pos_x, pos_y, vel_x, vel_y)
    s = jax.random.uniform(k_s, (N, 4), jnp.float32, -1.0, 1.0)
    # x: pairwise state differences (N, N, 4)
    x = s[:, None, :] - s[None, :, :]
    r = jnp.float32(0.5)

    fwd = jax.jit(functools.partial(network_cbf_forward, params=params))
    out, mask = fwd(s, x, r)
    out = jax.block_until_ready(out)
    mask = jax.block_until_ready(mask)

    _, bf16_epi = _tpu_generation()
    out_ref, mask_ref = _ref_forward(s, x, r, params, bf16_epi)

    assert out.shape == (N, N, 1) and mask.shape == (N, N, 1)
    assert jnp.allclose(mask, mask_ref)
    assert jnp.allclose(out, out_ref, atol=1e-2, rtol=1e-2), (
        float(jnp.max(jnp.abs(out - out_ref))))

    # TODO(synk): filter_agents' second PyTorch output (nonzero indices) has a
    # data-dependent shape and is unused by forward(), so it is not produced.
    print("KERNEL_OK")
</pallas_src>

<mosaic_0001>
module attributes {stable_mosaic.version = 11 : i64} {
  func.func @_cbf_kernel(%arg0: i32, %arg1: memref<4x1024xf32, #tpu.memory_space<vmem>>, %arg2: memref<1x1024xf32, #tpu.memory_space<vmem>>, %arg3: memref<1x1xf32, #tpu.memory_space<vmem>>, %arg4: memref<64x6xbf16, #tpu.memory_space<vmem>>, %arg5: memref<64x1xbf16, #tpu.memory_space<vmem>>, %arg6: memref<128x64xbf16, #tpu.memory_space<vmem>>, %arg7: memref<128x1xbf16, #tpu.memory_space<vmem>>, %arg8: memref<64x128xbf16, #tpu.memory_space<vmem>>, %arg9: memref<64x1xbf16, #tpu.memory_space<vmem>>, %arg10: memref<8x64xbf16, #tpu.memory_space<vmem>>, %arg11: memref<1x1xf32, #tpu.memory_space<vmem>>, %arg12: memref<1x2x1024xf32, #tpu.memory_space<vmem>>) attributes {dimension_semantics = [#tpu.dimension_semantics<parallel>], iteration_bounds = array<i64: 1>, scalar_prefetch = 0 : i64, scratch_operands = 0 : i64, tpu.core_type = #tpu.core_type<tc>, window_params = [{transform_indices = @transform_0, window_bounds = array<i64: 4, 1024>}, {transform_indices = @transform_1, window_bounds = array<i64: 1, 1024>}, {pipeline_mode = #tpu.pipeline_mode<synchronous>, transform_indices = @transform_2, window_bounds = array<i64: 1, 1>}, {pipeline_mode = #tpu.pipeline_mode<synchronous>, transform_indices = @transform_3, window_bounds = array<i64: 64, 6>}, {pipeline_mode = #tpu.pipeline_mode<synchronous>, transform_indices = @transform_4, window_bounds = array<i64: 64, 1>}, {pipeline_mode = #tpu.pipeline_mode<synchronous>, transform_indices = @transform_5, window_bounds = array<i64: 128, 64>}, {pipeline_mode = #tpu.pipeline_mode<synchronous>, transform_indices = @transform_6, window_bounds = array<i64: 128, 1>}, {pipeline_mode = #tpu.pipeline_mode<synchronous>, transform_indices = @transform_7, window_bounds = array<i64: 64, 128>}, {pipeline_mode = #tpu.pipeline_mode<synchronous>, transform_indices = @transform_8, window_bounds = array<i64: 64, 1>}, {pipeline_mode = #tpu.pipeline_mode<synchronous>, transform_indices = @transform_9, window_bounds = array<i64: 8, 64>}, {pipeline_mode = #tpu.pipeline_mode<synchronous>, transform_indices = @transform_10, window_bounds = array<i64: 1, 1>}, {transform_indices = @transform_11, window_bounds = array<i64: 1, 2, 1024>}]} {
    %c0 = arith.constant 0 : index
    %c0_0 = arith.constant 0 : index
    %0 = vector.load %arg1[%c0, %c0_0] : memref<4x1024xf32, #tpu.memory_space<vmem>>, vector<4x1024xf32>
    %c0_1 = arith.constant 0 : index
    %c0_2 = arith.constant 0 : index
    %1 = vector.load %arg2[%c0_1, %c0_2] : memref<1x1024xf32, #tpu.memory_space<vmem>>, vector<1x1024xf32>
    %cst = arith.constant 5.000000e-01 : f32
    %2 = vector.broadcast %cst : f32 to vector<1x1024xf32>
    %3 = arith.cmpf ogt, %1, %2 : vector<1x1024xf32>
    %4 = vector.extract_strided_slice %0 {offsets = [0, 0], sizes = [1, 1024], strides = [1, 1]} : vector<4x1024xf32> to vector<1x1024xf32>
    %5 = vector.extract_strided_slice %0 {offsets = [1, 0], sizes = [1, 1024], strides = [1, 1]} : vector<4x1024xf32> to vector<1x1024xf32>
    %6 = arith.mulf %4, %4 : vector<1x1024xf32>
    %7 = arith.mulf %5, %5 : vector<1x1024xf32>
    %8 = arith.addf %6, %7 : vector<1x1024xf32>
    %cst_3 = arith.constant 2.000000e-04 : f32
    %9 = vector.broadcast %cst_3 : f32 to vector<1x1024xf32>
    %10 = arith.addf %8, %9 : vector<1x1024xf32>
    %11 = math.sqrt %10 : vector<1x1024xf32>
    %cst_4 = arith.constant 0.000000e+00 : f32
    %12 = vector.broadcast %cst_4 : f32 to vector<1x1024xf32>
    %c0_5 = arith.constant 0 : index
    %c0_6 = arith.constant 0 : index
    %13 = vector.load %arg3[%c0_5, %c0_6] : memref<1x1xf32, #tpu.memory_space<vmem>>, vector<1x1xf32>
    %14 = vector.broadcast %13 : vector<1x1xf32> to vector<1x1024xf32>
    %15 = arith.subf %11, %14 : vector<1x1024xf32>
    %16 = tpu.concatenate %0, %12, %15 in 0 : vector<4x1024xf32>, vector<1x1024xf32>, vector<1x1024xf32> -> vector<6x1024xf32>
    %cst_7 = arith.constant 1.000000e+02 : f32
    %17 = vector.shape_cast %3 : vector<1x1024xi1> to vector<1x1024xi1>
    %18 = vector.broadcast %17 : vector<1x1024xi1> to vector<6x1024xi1>
    %19 = vector.broadcast %cst_7 : f32 to vector<6x1024xf32>
    %20 = arith.select %18, %16, %19 : vector<6x1024xi1>, vector<6x1024xf32>
    %21 = vector.extract_strided_slice %20 {offsets = [0, 0], sizes = [1, 1024], strides = [1, 1]} : vector<6x1024xf32> to vector<1x1024xf32>
    %22 = vector.extract_strided_slice %20 {offsets = [1, 0], sizes = [1, 1024], strides = [1, 1]} : vector<6x1024xf32> to vector<1x1024xf32>
    %23 = arith.mulf %21, %21 : vector<1x1024xf32>
    %24 = arith.mulf %22, %22 : vector<1x1024xf32>
    %25 = arith.addf %23, %24 : vector<1x1024xf32>
    %cst_8 = arith.constant 2.000000e-04 : f32
    %26 = vector.broadcast %cst_8 : f32 to vector<1x1024xf32>
    %27 = arith.addf %25, %26 : vector<1x1024xf32>
    %28 = math.sqrt %27 : vector<1x1024xf32>
    %cst_9 = arith.constant 1.000000e+00 : f32
    %29 = vector.broadcast %cst_9 : f32 to vector<1x1024xf32>
    %30 = arith.cmpf ole, %28, %29 : vector<1x1024xf32>
    %31 = arith.extui %30 : vector<1x1024xi1> to vector<1x1024xi32>
    %32 = arith.sitofp %31 : vector<1x1024xi32> to vector<1x1024xf32>
    %c0_10 = arith.constant 0 : index
    %c0_11 = arith.constant 0 : index
    %33 = vector.load %arg4[%c0_10, %c0_11] : memref<64x6xbf16, #tpu.memory_space<vmem>>, vector<64x6xbf16>
    %34 = arith.truncf %20 : vector<6x1024xf32> to vector<6x1024xbf16>
    %cst_12 = arith.constant dense<0.000000e+00> : vector<64x1024xf32>
    %35 = tpu.matmul %33, %34, %cst_12 {dimension_numbers = #tpu.dot_dimension_numbers<[1], [0], [0], [1], [0, 0, 1, 1], [], []>} : vector<64x6xbf16>, vector<6x1024xbf16>, vector<64x1024xf32> -> vector<64x1024xf32>
    %36 = arith.truncf %35 : vector<64x1024xf32> to vector<64x1024xbf16>
    %c0_13 = arith.constant 0 : index
    %c0_14 = arith.constant 0 : index
    %37 = vector.load %arg5[%c0_13, %c0_14] : memref<64x1xbf16, #tpu.memory_space<vmem>>, vector<64x1xbf16>
    %38 = vector.broadcast %37 : vector<64x1xbf16> to vector<64x1024xbf16>
    %39 = arith.addf %36, %38 : vector<64x1024xbf16>
    %cst_15 = arith.constant 0.000000e+00 : bf16
    %40 = vector.broadcast %cst_15 : bf16 to vector<64x1024xbf16>
    %41 = arith.maximumf %39, %40 : vector<64x1024xbf16>
    %c0_16 = arith.constant 0 : index
    %c0_17 = arith.constant 0 : index
    %42 = vector.load %arg6[%c0_16, %c0_17] : memref<128x64xbf16, #tpu.memory_space<vmem>>, vector<128x64xbf16>
    %cst_18 = arith.constant dense<0.000000e+00> : vector<128x1024xf32>
    %43 = tpu.matmul %42, %41, %cst_18 {dimension_numbers = #tpu.dot_dimension_numbers<[1], [0], [0], [1], [0, 0, 1, 1], [], []>} : vector<128x64xbf16>, vector<64x1024xbf16>, vector<128x1024xf32> -> vector<128x1024xf32>
    %44 = arith.truncf %43 : vector<128x1024xf32> to vector<128x1024xbf16>
    %c0_19 = arith.constant 0 : index
    %c0_20 = arith.constant 0 : index
    %45 = vector.load %arg7[%c0_19, %c0_20] : memref<128x1xbf16, #tpu.memory_space<vmem>>, vector<128x1xbf16>
    %46 = vector.broadcast %45 : vector<128x1xbf16> to vector<128x1024xbf16>
    %47 = arith.addf %44, %46 : vector<128x1024xbf16>
    %cst_21 = arith.constant 0.000000e+00 : bf16
    %48 = vector.broadcast %cst_21 : bf16 to vector<128x1024xbf16>
    %49 = arith.maximumf %47, %48 : vector<128x1024xbf16>
    %c0_22 = arith.constant 0 : index
    %c0_23 = arith.constant 0 : index
    %50 = vector.load %arg8[%c0_22, %c0_23] : memref<64x128xbf16, #tpu.memory_space<vmem>>, vector<64x128xbf16>
    %cst_24 = arith.constant dense<0.000000e+00> : vector<64x1024xf32>
    %51 = tpu.matmul %50, %49, %cst_24 {dimension_numbers = #tpu.dot_dimension_numbers<[1], [0], [0], [1], [0, 0, 1, 1], [], []>} : vector<64x128xbf16>, vector<128x1024xbf16>, vector<64x1024xf32> -> vector<64x1024xf32>
    %52 = arith.truncf %51 : vector<64x1024xf32> to vector<64x1024xbf16>
    %c0_25 = arith.constant 0 : index
    %c0_26 = arith.constant 0 : index
    %53 = vector.load %arg9[%c0_25, %c0_26] : memref<64x1xbf16, #tpu.memory_space<vmem>>, vector<64x1xbf16>
    %54 = vector.broadcast %53 : vector<64x1xbf16> to vector<64x1024xbf16>
    %55 = arith.addf %52, %54 : vector<64x1024xbf16>
    %cst_27 = arith.constant 0.000000e+00 : bf16
    %56 = vector.broadcast %cst_27 : bf16 to vector<64x1024xbf16>
    %57 = arith.maximumf %55, %56 : vector<64x1024xbf16>
    %c0_28 = arith.constant 0 : index
    %c0_29 = arith.constant 0 : index
    %58 = vector.load %arg10[%c0_28, %c0_29] : memref<8x64xbf16, #tpu.memory_space<vmem>>, vector<8x64xbf16>
    %cst_30 = arith.constant dense<0.000000e+00> : vector<8x1024xf32>
    %59 = tpu.matmul %58, %57, %cst_30 {dimension_numbers = #tpu.dot_dimension_numbers<[1], [0], [0], [1], [0, 0, 1, 1], [], []>} : vector<8x64xbf16>, vector<64x1024xbf16>, vector<8x1024xf32> -> vector<8x1024xf32>
    %60 = vector.extract_strided_slice %59 {offsets = [0, 0], sizes = [1, 1024], strides = [1, 1]} : vector<8x1024xf32> to vector<1x1024xf32>
    %c0_31 = arith.constant 0 : index
    %c0_32 = arith.constant 0 : index
    %61 = vector.load %arg11[%c0_31, %c0_32] : memref<1x1xf32, #tpu.memory_space<vmem>>, vector<1x1xf32>
    %62 = vector.broadcast %61 : vector<1x1xf32> to vector<1x1024xf32>
    %63 = arith.addf %60, %62 : vector<1x1024xf32>
    %64 = arith.mulf %63, %32 : vector<1x1024xf32>
    %65 = tpu.concatenate %64, %32 in 0 : vector<1x1024xf32>, vector<1x1024xf32> -> vector<2x1024xf32>
    %66 = vector.shape_cast %65 : vector<2x1024xf32> to vector<1x2x1024xf32>
    %c0_33 = arith.constant 0 : index
    %c0_34 = arith.constant 0 : index
    %c0_35 = arith.constant 0 : index
    %67 = vector.load %arg12[%c0_33, %c0_34, %c0_35] : memref<1x2x1024xf32, #tpu.memory_space<vmem>>, vector<1x2x1024xf32>
    tpu.vector_store %arg12[%c0_33, %c0_34, %c0_35], %66 {strides = array<i32>} : memref<1x2x1024xf32, #tpu.memory_space<vmem>>, vector<1x2x1024xf32>,
    return
  }
  func.func @transform_0(%arg0: i32) -> (i32, i32) {
    %c0_i32 = arith.constant 0 : i32
    %c0_i32_0 = arith.constant 0 : i32
    return %c0_i32, %arg0 : i32, i32
  }
  func.func @transform_1(%arg0: i32) -> (i32, i32) {
    %c0_i32 = arith.constant 0 : i32
    %c0_i32_0 = arith.constant 0 : i32
    return %c0_i32, %arg0 : i32, i32
  }
  func.func @transform_2(%arg0: i32) -> (i32, i32) {
    %c0_i32 = arith.constant 0 : i32
    %c0_i32_0 = arith.constant 0 : i32
    %c0_i32_1 = arith.constant 0 : i32
    return %c0_i32, %c0_i32_0 : i32, i32
  }
  func.func @transform_3(%arg0: i32) -> (i32, i32) {
    %c0_i32 = arith.constant 0 : i32
    %c0_i32_0 = arith.constant 0 : i32
    %c0_i32_1 = arith.constant 0 : i32
    return %c0_i32, %c0_i32_0 : i32, i32
  }
  func.func @transform_4(%arg0: i32) -> (i32, i32) {
    %c0_i32 = arith.constant 0 : i32
    %c0_i32_0 = arith.constant 0 : i32
    %c0_i32_1 = arith.constant 0 : i32
    return %c0_i32, %c0_i32_0 : i32, i32
  }
  func.func @transform_5(%arg0: i32) -> (i32, i32) {
    %c0_i32 = arith.constant 0 : i32
    %c0_i32_0 = arith.constant 0 : i32
    %c0_i32_1 = arith.constant 0 : i32
    return %c0_i32, %c0_i32_0 : i32, i32
  }
  func.func @transform_6(%arg0: i32) -> (i32, i32) {
    %c0_i32 = arith.constant 0 : i32
    %c0_i32_0 = arith.constant 0 : i32
    %c0_i32_1 = arith.constant 0 : i32
    return %c0_i32, %c0_i32_0 : i32, i32
  }
  func.func @transform_7(%arg0: i32) -> (i32, i32) {
    %c0_i32 = arith.constant 0 : i32
    %c0_i32_0 = arith.constant 0 : i32
    %c0_i32_1 = arith.constant 0 : i32
    return %c0_i32, %c0_i32_0 : i32, i32
  }
  func.func @transform_8(%arg0: i32) -> (i32, i32) {
    %c0_i32 = arith.constant 0 : i32
    %c0_i32_0 = arith.constant 0 : i32
    %c0_i32_1 = arith.constant 0 : i32
    return %c0_i32, %c0_i32_0 : i32, i32
  }
  func.func @transform_9(%arg0: i32) -> (i32, i32) {
    %c0_i32 = arith.constant 0 : i32
    %c0_i32_0 = arith.constant 0 : i32
    %c0_i32_1 = arith.constant 0 : i32
    return %c0_i32, %c0_i32_0 : i32, i32
  }
  func.func @transform_10(%arg0: i32) -> (i32, i32) {
    %c0_i32 = arith.constant 0 : i32
    %c0_i32_0 = arith.constant 0 : i32
    %c0_i32_1 = arith.constant 0 : i32
    return %c0_i32, %c0_i32_0 : i32, i32
  }
  func.func @transform_11(%arg0: i32) -> (i32, i32, i32) {
    %c0_i32 = arith.constant 0 : i32
    %c0_i32_0 = arith.constant 0 : i32
    %c0_i32_1 = arith.constant 0 : i32
    return %arg0, %c0_i32, %c0_i32_0 : i32, i32, i32
  }
}

</mosaic_0001>

<bundles_post_ra>
// kernel: squeeze.2
= control target key start
LH: loop header
LB: loop body
LE: loop exit
PB: predicated region body
PF: predicated region fallthrough
CT: control target
= control target key end

     0   :  { %vm4_vm0 = vcmask 261120   ;;  %s95_s0 = inlined_call_operand.vmem [shape: f32[1024], index: 0, kind: input, shape index: {}]   ;;  %s96_s1 = inlined_call_operand.hbm [shape: f32[32,32,1], index: 1, kind: output, shape index: {}]  }
   0x1   :  { %v6_v0 = vld [vmem:[%s95_s0] sm:$0xff]  }
   0x2   :  { %2 = vsyncpa [#allocation1], 0  ;;  %s62_s0 = smov 96   ;;  %s63_s8 = smov 32   ;;  %5 = vst.msk [vmem:[#allocation0] ss:$4 sm:$0xff] %vm4_vm0, %v6_v0  }
   0x3   :  { %7 = vrot.lane.b32.xlu0 %v6_v0, %s62_s0  ;;  %19 = vrot.lane.b32.xlu1 %v6_v0, %s63_s8  ;;  %s64_s9 = smov 64   ;;  %s65_s10 = smov [#allocation0]  }
   0x4   :  { %s28_s11 = sshll.u32 %s65_s10, 4  ;;  %s29_s11 = int_to_ptr.vmem [resolvable:$true] %s28_s11 }
   0x5   :  { %s38_s12 = scalar_lea.vmem %s29_s11, 512  ;;  %p43_p1 = scmp.lt.s32.totalorder %s29_s11, %s29_s11 }
   0x6   :  { %p39_p0 = scmp.ne.s32.totalorder %s29_s11, %s38_s12  ;;  %p44_p2 = scmp.lt.s32.totalorder %s38_s12, %s38_s12 }
   0x7   :  { %13 = vrot.lane.b32.xlu0 %v6_v0, %s64_s9 }
   0x8   :  { %p45_p3 = por %p44_p2, %p43_p1 }
   0xa   :  { %p46_p4 = pnand %p45_p3, %p39_p0 }
  0x75   :  { %v8_v1 = vpop.permute.xlu0 %7   ;;  %v20_v2 = vpop.permute.xlu1 %19  }
  0x76   :  { %11 = vst.msk [vmem:[#allocation0 + $0x1] ss:$4 sm:$0xff] %vm4_vm0, %v8_v1   ;;  %23 = vst.msk [vmem:[#allocation0 + $0x3] ss:$4 sm:$0xff] %vm4_vm0, %v20_v2  }
  0x79   :  { %v14_v3 = vpop.permute.xlu0 %13  }
  0x7a   :  { %17 = vst.msk [vmem:[#allocation0 + $0x2] ss:$4 sm:$0xff] %vm4_vm0, %v14_v3  }
  0x7b   :  { %49 = shalt.err (!%p46_p4)
}
  0x7c   :  { %s50_s15 = scalar_lea.hbm %s96_s1, 512 }
  0x7d   :  { %p51_p5 = scmp.ne.s32.totalorder %s96_s1, %s50_s15  ;;  %p54_p6 = scmp.lt.u32.totalorder %s50_s15, %s96_s1 }
  0x7f   :  { %p56_p7 = pnand %p54_p6, %p51_p5 }
  0x81   :  { %59 = shalt.err (!%p56_p7)
}
  0x82   :  { %31 = dma.vmem_to_hbm [thread:$0]  %s29_s11, 512, %s96_s1, [#allocation1]  }
  0x83   :  { %60 = dma.done.wait [#allocation1], 512  }
  0x84   :  { %61 = vsyncadd [#allocation1], 4294966784 }
  0x85   :  { %33 = vsyncpa [#allocation1], 1 }

// kernel: network_cbf_forward.1
= control target key start
LH: loop header
LB: loop body
LE: loop exit
PB: predicated region body
PF: predicated region fallthrough
CT: control target
= control target key end

     0   :  { %v2916_v0 = vmov 0   ;;  %v111_v57 = vlaneseq  ;;  %vm175_vm1 = vcmask 1043456   ;;  %vm184_vm9 = vcmask 1044480   ;;  %s3832_s2 = inlined_call_operand.<no memory space> [shape: f32[1,1], index: 2, kind: input, shape index: {}]   ;;  %s3833_s4 = inlined_call_operand.vmem [shape: bf16[64,1], index: 4, kind: input, shape index: {}]   ;;  %s3834_s6 = inlined_call_operand.vmem [shape: bf16[128,1], index: 6, kind: input, shape index: {}]   ;;  %s3835_s3 = inlined_call_operand.vmem [shape: bf16[64,6], index: 3, kind: input, shape index: {}]   ;;  %s3836_s8 = inlined_call_operand.vmem [shape: bf16[64,1], index: 8, kind: input, shape index: {}]   ;;  %s3837_s10 = inlined_call_operand.<no memory space> [shape: f32[1,1], index: 10, kind: input, shape index: {}]   ;;  %s3838_s0 = inlined_call_operand.vmem [shape: f32[4,1024], index: 0, kind: input, shape index: {}]   ;;  %s3839_s1 = inlined_call_operand.vmem [shape: f32[1,1024], index: 1, kind: input, shape index: {}]   ;;  %s3840_s5 = inlined_call_operand.vmem [shape: bf16[128,64], index: 5, kind: input, shape index: {}]   ;;  %s3841_s7 = inlined_call_operand.vmem [shape: bf16[64,128], index: 7, kind: input, shape index: {}]   ;;  %s3842_s9 = inlined_call_operand.vmem [shape: bf16[8,64], index: 9, kind: input, shape index: {}]   ;;  %s3843_s11 = inlined_call_operand.vmem [shape: f32[1,2,1024], index: 11, kind: output, shape index: {}]  }
   0x1   :  { %2870 = vset.pattern.permute.xlu0 %v2916_v0  ;;  %v16_v1 = vstv %s3832_s2  ;;  %2871 = vset.pattern.permute.xlu1 %v2916_v0  ;;  %v769_v2 = vld [vmem:[%s3833_s4 + $0x4] sm:$0xf]  ;;  %v770_v3 = vld [vmem:[%s3833_s4 + $0x8] sm:$0xf]  ;;  %v772_v4 = vld [vmem:[%s3833_s4 + $0x10] sm:$0xf] }
   0x2   :  { %17 = vst [vmem:[#allocation2] sm:$0x1] %v16_v1  ;;  %790 = vperm.xlu1 %2871, %v769_v2   ;;  %476 = vmatprep.mubr.bf16.mxu0 %v2916_v0  ;;  %v768_v6 = vld [vmem:[%s3833_s4] sm:$0xf]  ;;  %v774_v7 = vld [vmem:[%s3833_s4 + $0x18] sm:$0xf]  ;;  %v18_v35 = vstv %s3837_s10 }
   0x3   :  { %549 = vmatprep.mubr.bf16.mxu1 %v2916_v0  ;;  %v771_v8 = vld [vmem:[%s3833_s4 + $0xc] sm:$0xf]  ;;  %v1557_v9 = vld [vmem:[%s3834_s6] sm:$0xf]  ;;  %v773_v10 = vld [vmem:[%s3833_s4 + $0x14] sm:$0xf] }
   0x4   :  { %v1559_v11 = vld [vmem:[%s3834_s6 + $0x8] sm:$0xf]  ;;  %v775_v12 = vld [vmem:[%s3833_s4 + $0x1c] sm:$0xf]  ;;  %v1561_v13 = vld [vmem:[%s3834_s6 + $0x10] sm:$0xf] }
   0x5   :  { %v1558_v14 = vld [vmem:[%s3834_s6 + $0x4] sm:$0xf]  ;;  %v1563_v15 = vld [vmem:[%s3834_s6 + $0x18] sm:$0xf]  ;;  %v1560_v16 = vld [vmem:[%s3834_s6 + $0xc] sm:$0xf] }
   0x6   :  { %802 = vperm.xlu1 %2871, %v770_v3   ;;  %v1565_v17 = vld [vmem:[%s3834_s6 + $0x20] sm:$0xf]  ;;  %v1562_v18 = vld [vmem:[%s3834_s6 + $0x14] sm:$0xf]  ;;  %v1567_v19 = vld [vmem:[%s3834_s6 + $0x28] sm:$0xf] }
   0x7   :  { %v1564_v20 = vld [vmem:[%s3834_s6 + $0x1c] sm:$0xf]  ;;  %v1569_v21 = vld [vmem:[%s3834_s6 + $0x30] sm:$0xf]  ;;  %v1566_v22 = vld [vmem:[%s3834_s6 + $0x24] sm:$0xf] }
   0x8   :  { %v1571_v23 = vld [vmem:[%s3834_s6 + $0x38] sm:$0xf]  ;;  %v1568_v24 = vld [vmem:[%s3834_s6 + $0x2c] sm:$0xf]  ;;  %v2297_v25 = vld [vmem:[%s3836_s8] sm:$0xf] }
   0x9   :  { %v105_v5 = vld [vmem:[#allocation2] sm:$0x1]  ;;  %v1570_v26 = vld [vmem:[%s3834_s6 + $0x34] sm:$0xf]  ;;  %v2299_v27 = vld [vmem:[%s3836_s8 + $0x8] sm:$0xf] }
   0xa   :  { %108 = vperm.xlu0 %2870, %v105_v5   ;;  %826 = vperm.xlu1 %2871, %v772_v4   ;;  %v1572_v28 = vld [vmem:[%s3834_s6 + $0x3c] sm:$0xf]  ;;  %v2301_v29 = vld [vmem:[%s3836_s8 + $0x10] sm:$0xf]  ;;  %v2298_v30 = vld [vmem:[%s3836_s8 + $0x4] sm:$0xf] }
   0xb   :  { %v2303_v31 = vld [vmem:[%s3836_s8 + $0x18] sm:$0xf]  ;;  %v2300_v32 = vld [vmem:[%s3836_s8 + $0xc] sm:$0xf]  ;;  %v2302_v33 = vld [vmem:[%s3836_s8 + $0x14] sm:$0xf] }
   0xc   :  { %v2304_v34 = vld [vmem:[%s3836_s8 + $0x1c] sm:$0xf]  ;;  %19 = vst [vmem:[#allocation3] sm:$0x1] %v18_v35  ;;  %v3089_v37 = vld [vmem:[%s3838_s0] sm:$0xff]  ;;  %v3094_v38 = vld [vmem:[%s3838_s0 + $0x8] sm:$0xff] }
   0xd   :  { %v3099_v39 = vld [vmem:[%s3838_s0 + $0x10] sm:$0xff]  ;;  %v49_v40 = vmul.f32 %v3089_v37, %v3089_v37  ;;  %v50_v41 = vmul.f32 %v3094_v38, %v3094_v38  ;;  %v3108_v42 = vld [vmem:[%s3838_s0 + $0x18] sm:$0xff]  ;;  %v47_v58 = vld [vmem:[%s3839_s1] sm:$0xff]  ;;  %v3117_v60 = vshrl.u32 %v111_v57, 7  ;;  %v123_v2 = vcombine.high %v3089_v37, %v3089_v37 }
   0xe   :  { %778 = vperm.xlu0 %2870, %v768_v6   ;;  %850 = vperm.xlu1 %2871, %v774_v7   ;;  %v51_v43 = vmul.f32 %v3099_v39, %v3099_v39  ;;  %v52_v45 = vmul.f32 %v3108_v42, %v3108_v42  ;;  %vm48_vm0 = vcmp.gt.f32.partialorder %v47_v58, 0.5  ;;  %vm419_vm11 = vcmask 1042432  }
   0xf   :  { %v2766_v44 = vrot.slane %v49_v40, 9  ;;  %v2767_v46 = vrot.slane %v50_v41, 9  ;;  %v3120_v63 = vsub.s32 0, %v3117_v60  ;;  %v3123_v1 = vsub.s32 4, %v3117_v60 }
  0x10   :  { %v2768_v47 = vrot.slane %v51_v43, 9  ;;  %v2769_v49 = vrot.slane %v52_v45, 9  ;;  %v3128_v7 = vsel %vm48_vm0, 1, %v2916_v0 }
  0x11   :  { %v69_v48 = vadd.f32 %v2766_v44, %v49_v40  ;;  %v70_v50 = vadd.f32 %v2767_v46, %v50_v41 }
  0x12   :  { %814 = vperm.xlu0 %2870, %v771_v8   ;;  %1575 = vperm.xlu1 %2871, %v1557_v9   ;;  %v71_v51 = vadd.f32 %v2768_v47, %v51_v43  ;;  %v72_v53 = vadd.f32 %v2769_v49, %v52_v45  ;;  %v200_v8 = vsub.s32 1, %v3117_v60  ;;  %v176_v43 = vsel %vm175_vm1, %v3089_v37, 0.0 }
  0x13   :  { %v2657_v36 = vld [vmem:[#allocation3] sm:$0x1]  ;;  %v73_v52 = vadd.f32 0.0002, %v69_v48  ;;  %v74_v54 = vadd.f32 0.0002, %v70_v50 }
  0x14   :  { %v75_v55 = vadd.f32 0.0002, %v71_v51  ;;  %v76_v56 = vadd.f32 0.0002, %v72_v53  ;;  %v178_v47 = vsel %vm175_vm1, %v3094_v38, 0.0  ;;  %v126_v53 = vcombine.high %v3108_v42, %v3108_v42 }
  0x15   :  { %2892 = vrsqrt.f32 %v73_v52  ;;  %vm79_vm2 = vcmp.eq.f32.partialorder %v73_v52, inf  ;;  %vm86_vm3 = vcmp.eq.f32.partialorder %v74_v54, inf  ;;  %vm81_vm5 = vcmp.eq.f32.partialorder %v73_v52, 0.0 }
  0x16   :  { %838 = vperm.xlu0 %2870, %v773_v10   ;;  %1599 = vperm.xlu1 %2871, %v1559_v11   ;;  %2894 = vrsqrt.f32 %v74_v54  ;;  %vm93_vm4 = vcmp.eq.f32.partialorder %v75_v55, inf  ;;  %v82_v9 = vand.u32 2147483648, %v73_v52  ;;  %vm88_vm6 = vcmp.eq.f32.partialorder %v74_v54, 0.0 }
  0x17   :  { %2896 = vrsqrt.f32 %v75_v55  ;;  %v89_v10 = vand.u32 2147483648, %v74_v54  ;;  %vm95_vm7 = vcmp.eq.f32.partialorder %v75_v55, 0.0  ;;  %v96_v11 = vand.u32 2147483648, %v75_v55 }
  0x18   :  { %2898 = vrsqrt.f32 %v76_v56  ;;  %vm100_vm8 = vcmp.eq.f32.partialorder %v76_v56, inf  ;;  %vm102_vm10 = vcmp.eq.f32.partialorder %v76_v56, 0.0 }
  0x1a   :  { %862 = vperm.xlu0 %2870, %v775_v12   ;;  %1623 = vperm.xlu1 %2871, %v1561_v13  }
  0x1e   :  { %1587 = vperm.xlu0 %2870, %v1558_v14   ;;  %1647 = vperm.xlu1 %2871, %v1563_v15  }
  0x1f   :  { %v2893_v59 = vpop.eup %2892 }
  0x20   :  { %v2895_v61 = vpop.eup %2894  ;;  %v78_v4 = vmul.f32 %v2893_v59, %v73_v52 }
  0x21   :  { %v2897_v62 = vpop.eup %2896  ;;  %v85_v5 = vmul.f32 %v2895_v61, %v74_v54 }
  0x22   :  { %1611 = vperm.xlu0 %2870, %v1560_v16   ;;  %1671 = vperm.xlu1 %2871, %v1565_v17   ;;  %v2899_v3 = vpop.eup %2898  ;;  %v92_v6 = vmul.f32 %v2897_v62, %v75_v55  ;;  %v80_v13 = vsel %vm79_vm2, %v73_v52, %v78_v4  ;;  %v208_v16 = vsub.s32 3, %v3117_v60  ;;  %v124_v17 = vcombine.high %v3094_v38, %v3094_v38 }
  0x23   :  { %v99_v12 = vmul.f32 %v2899_v3, %v76_v56  ;;  %v87_v14 = vsel %vm86_vm3, %v74_v54, %v85_v5  ;;  %v220_v4 = vsub.s32 6, %v3117_v60  ;;  %vm406_vm3 = vcmask 48128  }
  0x24   :  { %v94_v15 = vsel %vm93_vm4, %v75_v55, %v92_v6 }
  0x26   :  { %1635 = vperm.xlu0 %2870, %v1562_v18   ;;  %1695 = vperm.xlu1 %2871, %v1567_v19   ;;  %v197_v18 = vrot.slane %v3128_v7, %v3120_v63  ;;  %v204_v19 = vsub.s32 2, %v3117_v60 }
  0x28   :  { %vm3154_vm13 = vcmp.eq.s32.totalorder %v197_v18, 1 }
  0x2a   :  { %1659 = vperm.xlu0 %2870, %v1564_v20   ;;  %1719 = vperm.xlu1 %2871, %v1569_v21   ;;  %v103_v20 = vand.u32 2147483648, %v76_v56  ;;  %v201_v21 = vrot.slane %v3128_v7, %v200_v8  ;;  %v183_v8 = vsel %vm175_vm1, %v126_v53, 0.0 }
  0x2c   :  { %vm227_vm12 = vcmp.eq.s32.totalorder %v201_v21, 1  ;;  %v182_v21 = vsel %vm175_vm1, %v3108_v42, 0.0 }
  0x2e   :  { %1683 = vperm.xlu0 %2870, %v1566_v22   ;;  %1743 = vperm.xlu1 %2871, %v1571_v23   ;;  %v216_v22 = vsub.s32 5, %v3117_v60 }
  0x30   :  { %v217_v45 = vrot.slane %v3128_v7, %v216_v22 }
  0x32   :  { %1707 = vperm.xlu0 %2870, %v1568_v24   ;;  %2307 = vperm.xlu1 %2871, %v2297_v25   ;;  %v83_v24 = vsel %vm81_vm5, %v82_v9, %v80_v13  ;;  %v90_v25 = vsel %vm88_vm6, %v89_v10, %v87_v14  ;;  %vm231_vm0 = vcmp.eq.s32.totalorder %v217_v45, 1 }
  0x36   :  { %1731 = vperm.xlu0 %2870, %v1570_v26   ;;  %2331 = vperm.xlu1 %2871, %v2299_v27   ;;  %v97_v26 = vsel %vm95_vm7, %v96_v11, %v94_v15  ;;  %v101_v27 = vsel %vm100_vm8, %v76_v56, %v99_v12  ;;  %v213_v11 = vrot.slane %v3128_v7, %v3123_v1 }
  0x37   :  { %v104_v35 = vsel %vm102_vm10, %v103_v20, %v101_v27 }
  0x38   :  { %vm230_vm4 = vcmp.eq.s32.totalorder %v213_v11, 1 }
  0x3a   :  { %1755 = vperm.xlu0 %2870, %v1572_v28   ;;  %2355 = vperm.xlu1 %2871, %v2301_v29   ;;  %v177_v29 = vsel %vm175_vm1, %v123_v2, 0.0 }
  0x3e   :  { %2319 = vperm.xlu0 %2870, %v2298_v30   ;;  %2379 = vperm.xlu1 %2871, %v2303_v31   ;;  %v209_v30 = vrot.slane %v3128_v7, %v208_v16  ;;  %v125_v31 = vcombine.high %v3099_v39, %v3099_v39  ;;  %v3209_v16 = vld [vmem:[%s3835_s3] sm:$0xff]  }
  0x40   :  { %vm229_vm14 = vcmp.eq.s32.totalorder %v209_v30, 1  ;;  %v181_v48 = vsel %vm175_vm1, %v125_v31, 0.0 }
  0x42   :  { %2343 = vperm.xlu0 %2870, %v2300_v32   ;;  %2660 = vperm.xlu1 %2871, %v2657_v36   ;;  %v179_v32 = vsel %vm175_vm1, %v124_v17, 0.0  ;;  %v221_v17 = vrot.slane %v3128_v7, %v220_v4 }
  0x44   :  { %vm232_vm5 = vcmp.eq.s32.totalorder %v221_v17, 1 }
  0x46   :  { %2367 = vperm.xlu0 %2870, %v2302_v33   ;;  %v205_v33 = vrot.slane %v3128_v7, %v204_v19  ;;  %v180_v19 = vsel %vm175_vm1, %v3099_v39, 0.0 }
  0x48   :  { %vm228_vm15 = vcmp.eq.s32.totalorder %v205_v33, 1 }
  0x4a   :  { %2391 = vperm.xlu0 %2870, %v2304_v34   ;;  %v224_v34 = vsub.s32 7, %v3117_v60 }
  0x4c   :  { %v225_v54 = vrot.slane %v3128_v7, %v224_v34 }
  0x4e   :  { %vm233_vm2 = vcmp.eq.s32.totalorder %v225_v54, 1 }
  0x89   :  { %v109_v23 = vpop.permute.xlu0 %108 }
  0x8a   :  { %v114_v28 = vrot.slane %v109_v23, %v3120_v63 }
  0x8c   :  { %v115_v36 = vsub.f32 %v83_v24, %v114_v28  ;;  %v116_v40 = vsub.f32 %v90_v25, %v114_v28  ;;  %v117_v41 = vsub.f32 %v97_v26, %v114_v28  ;;  %v118_v49 = vsub.f32 %v104_v35, %v114_v28 }
  0x8e   :  { %v158_v46 = vrot.slane %v117_v41, %v3123_v1  ;;  %v142_v50 = vrot.slane %v115_v36, %v3123_v1  ;;  %v150_v51 = vrot.slane %v116_v40, %v3123_v1  ;;  %v138_v37 = vrot.slane %v115_v36, %v3120_v63 }
  0x8f   :  { %v146_v52 = vrot.slane %v116_v40, %v3120_v63  ;;  %v166_v62 = vrot.slane %v118_v49, %v3123_v1  ;;  %v154_v13 = vrot.slane %v117_v41, %v3120_v63  ;;  %v162_v1 = vrot.slane %v118_v49, %v3120_v63 }
  0x90   :  { %v186_v55 = vsel %vm184_vm9, %v177_v29, %v142_v50  ;;  %v188_v38 = vsel %vm184_vm9, %v179_v32, %v150_v51  ;;  %v185_v56 = vsel %vm184_vm9, %v176_v43, %v138_v37  ;;  %v190_v61 = vsel %vm184_vm9, %v181_v48, %v158_v46  ;;  %v3233_v32 = vld [vmem:[%s3835_s3 + $0x8] sm:$0xff]   ;;  %v3245_v48 = vld [vmem:[%s3835_s3 + $0x10] sm:$0xff]   ;;  %v2879_v51 = vld [vmem:[%s3835_s3 + $0x18] sm:$0xff]  }
  0x91   :  { %v3174_v57 = vsel %vm227_vm12, %v186_v55, 100.0  ;;  %v3177_v58 = vsel %vm229_vm14, %v188_v38, 100.0  ;;  %v3181_v59 = vsel %vm3154_vm13, %v185_v56, 100.0  ;;  %v187_v6 = vsel %vm184_vm9, %v178_v47, %v146_v52 }
  0x92   :  { %v379_v2 = vpack.c.bf16 %v3174_v57, %v3174_v57  ;;  %v381_v3 = vpack.c.bf16 %v3177_v58, %v3177_v58  ;;  %v378_v5 = vpack.c.bf16 %v3181_v59, %v3181_v59  ;;  %v3197_v9 = vsel %vm228_vm15, %v187_v6, 100.0 }
  0x93   :  { %v239_v10 = vsel %vm231_vm0, %v190_v61, 100.0  ;;  %v380_v14 = vpack.c.bf16 %v3197_v9, %v3197_v9  ;;  %v192_v15 = vsel %vm184_vm9, %v183_v8, %v166_v62  ;;  %v189_v7 = vsel %vm184_vm9, %v180_v19, %v154_v13 }
  0x94   :  { %2782 = vmatprep.subr.msk.bf16.mxu0 %vm419_vm11, %v379_v2  ;;  %2787 = vmatprep.subr.msk.bf16.mxu1 %vm419_vm11, %v381_v3  ;;  %v421_v12 = vsel %vm419_vm11, %v378_v5, 0  ;;  %v383_v18 = vpack.c.bf16 %v239_v10, %v239_v10  ;;  %v241_v22 = vsel %vm233_vm2, %v192_v15, 100.0  ;;  %v247_v24 = vmul.f32 %v239_v10, %v239_v10 }
  0x95   :  { %445 = vmatpush1.bf16.msra.mxu0 %v421_v12  ;;  %v427_v20 = vsel %vm419_vm11, %v380_v14, 0  ;;  %v385_v23 = vpack.c.bf16 %v241_v22, %v241_v22  ;;  %v238_v39 = vsel %vm230_vm4, %v189_v7, 100.0  ;;  %v191_v25 = vsel %vm184_vm9, %v182_v21, %v162_v1  ;;  %v779_v7 = vpop.permute.xlu0 %778 }
  0x96   :  { %518 = vmatpush1.bf16.msra.mxu1 %v427_v20  ;;  %2792 = vmatprep.subr.msk.bf16.mxu0 %vm419_vm11, %v383_v18  ;;  %v246_v42 = vmul.f32 %v238_v39, %v238_v39  ;;  %v382_v26 = vpack.c.bf16 %v238_v39, %v238_v39  ;;  %v249_v27 = vmul.f32 %v241_v22, %v241_v22  ;;  %v240_v28 = vsel %vm232_vm5, %v191_v25, 100.0 }
  0x97   :  { %2797 = vmatprep.subr.msk.bf16.mxu1 %vm419_vm11, %v385_v23  ;;  %v248_v31 = vmul.f32 %v240_v28, %v240_v28  ;;  %v263_v33 = vrot.slane %v247_v24, 1  ;;  %v384_v34 = vpack.c.bf16 %v240_v28, %v240_v28  ;;  %v2917_v5 = vmov 0.0   ;;  %v791_v23 = vpop.permute.xlu1 %790 }
  0x98   :  { %2783 = vmatmul.mubr.msk.bf16.vlgmr.msra.gmra.mrb[0].mxu0 %vm406_vm3, %v3209_v16  ;;  %v262_v29 = vrot.slane %v246_v42, 1  ;;  %v433_v30 = vsel %vm419_vm11, %v382_v26, 0  ;;  %v265_v40 = vrot.slane %v249_v27, 1  ;;  %vm1016_vm2 = vcmask 523264  }
  0x99   :  { %486 = vmatprep.mubr.bf16.mxu0 %v2916_v0  ;;  %2788 = vmatmul.mubr.msk.bf16.vlgmr.msra.gmra.mrb[0].mxu1 %vm406_vm3, %v3209_v16  ;;  %v264_v36 = vrot.slane %v248_v31, 1  ;;  %v439_v41 = vsel %vm419_vm11, %v384_v34, 0  ;;  %v279_v44 = vadd.f32 %v263_v33, %v247_v24  ;;  %v815_v33 = vpop.permute.xlu0 %814 }
  0x9a   :  { %559 = vmatprep.mubr.bf16.mxu1 %v2916_v0  ;;  %591 = vmatpush1.bf16.msra.mxu0 %v433_v30  ;;  %v278_v35 = vadd.f32 %v262_v29, %v246_v42  ;;  %v281_v47 = vadd.f32 %v265_v40, %v249_v27 }
  0x9b   :  { %v280_v43 = vadd.f32 %v264_v36, %v248_v31  ;;  %664 = vmatpush1.bf16.msra.mxu1 %v439_v41  ;;  %v287_v49 = vadd.f32 0.0002, %v279_v44  ;;  %v803_v42 = vpop.permute.xlu1 %802 }
  0x9c   :  { %v286_v45 = vadd.f32 0.0002, %v278_v35  ;;  %v289_v50 = vadd.f32 0.0002, %v281_v47 }
  0x9d   :  { %v288_v46 = vadd.f32 0.0002, %v280_v43  ;;  %vm327_vm11 = vcmp.eq.f32.partialorder %v287_v49, inf  ;;  %v330_v11 = vand.u32 2147483648, %v287_v49  ;;  %vm329_vm12 = vcmp.eq.f32.partialorder %v287_v49, 0.0 }
  0x9e   :  { %2900 = vrsqrt.f32 %v286_v45  ;;  %vm320_vm1 = vcmp.eq.f32.partialorder %v286_v45, inf  ;;  %v323_v38 = vand.u32 2147483648, %v286_v45  ;;  %vm322_vm6 = vcmp.eq.f32.partialorder %v286_v45, 0.0 }
  0x9f   :  { %2902 = vrsqrt.f32 %v288_v46  ;;  %vm334_vm7 = vcmp.eq.f32.partialorder %v288_v46, inf  ;;  %v337_v61 = vand.u32 2147483648, %v288_v46  ;;  %vm336_vm8 = vcmp.eq.f32.partialorder %v288_v46, 0.0 }
  0xa0   :  { %2784 = vmatmul.mubr.msk.bf16.gmra.mrb[4].mxu0 %vm406_vm3, %v3233_v32  ;;  %2904 = vrsqrt.f32 %v287_v49  ;;  %vm341_vm13 = vcmp.eq.f32.partialorder %v289_v50, inf  ;;  %v344_v15 = vand.u32 2147483648, %v289_v50  ;;  %vm343_vm15 = vcmp.eq.f32.partialorder %v289_v50, 0.0 }
  0xa1   :  { %496 = vmatprep.mubr.bf16.mxu0 %v2916_v0  ;;  %2789 = vmatmul.mubr.msk.bf16.gmra.mrb[4].mxu1 %vm406_vm3, %v3233_v32  ;;  %2906 = vrsqrt.f32 %v289_v50 }
  0xa2   :  { %569 = vmatprep.mubr.bf16.mxu1 %v2916_v0 }
  0xa8   :  { %2785 = vmatmul.mubr.msk.bf16.gmra.mrb[8].mxu0 %vm406_vm3, %v3245_v48  ;;  %v2901_v37 = vpop.eup %2900 }
  0xa9   :  { %506 = vmatprep.mubr.bf16.mxu0 %v2916_v0  ;;  %2790 = vmatmul.mubr.msk.bf16.gmra.mrb[8].mxu1 %vm406_vm3, %v3245_v48  ;;  %v2903_v52 = vpop.eup %2902  ;;  %v319_v53 = vmul.f32 %v2901_v37, %v286_v45 }
  0xaa   :  { %579 = vmatprep.mubr.bf16.mxu1 %v2916_v0  ;;  %v333_v54 = vmul.f32 %v2903_v52, %v288_v46  ;;  %v2905_v56 = vpop.eup %2904 }
  0xab   :  { %v321_v55 = vsel %vm320_vm1, %v286_v45, %v319_v53  ;;  %v2907_v3 = vpop.eup %2906  ;;  %v326_v8 = vmul.f32 %v2905_v56, %v287_v49 }
  0xac   :  { %v324_v62 = vsel %vm322_vm6, %v323_v38, %v321_v55  ;;  %v335_v2 = vsel %vm334_vm7, %v288_v46, %v333_v54  ;;  %v340_v13 = vmul.f32 %v2907_v3, %v289_v50  ;;  %v839_v3 = vpop.permute.xlu0 %838 }
  0xad   :  { %vm350_vm9 = vcmp.le.f32.partialorder %v324_v62, 1.0  ;;  %v338_v4 = vsel %vm336_vm8, %v337_v61, %v335_v2  ;;  %v328_v12 = vsel %vm327_vm11, %v287_v49, %v326_v8 }
  0xae   :  { %v3261_v6 = vsel %vm350_vm9, 1.0, %v2917_v5  ;;  %vm352_vm10 = vcmp.le.f32.partialorder %v338_v4, 1.0  ;;  %v331_v14 = vsel %vm329_vm12, %v330_v11, %v328_v12  ;;  %v342_v17 = vsel %vm341_vm13, %v289_v50, %v340_v13 }
  0xaf   :  { %v3264_v10 = vsel %vm352_vm10, 1.0, %v2917_v5  ;;  %vm351_vm14 = vcmp.le.f32.partialorder %v331_v14, 1.0  ;;  %v345_v18 = vsel %vm343_vm15, %v344_v15, %v342_v17 }
  0xb0   :  { %2786 = vmatmul.mubr.msk.bf16.gmra.mrb[12].mxu0 %vm406_vm3, %v2879_v51  ;;  %v3273_v1 = vsel %vm351_vm14, 1.0, %v2917_v5  ;;  %vm353_vm0 = vcmp.le.f32.partialorder %v345_v18, 1.0  ;;  %vm2707_vm14 = vcmask 1040384  }
  0xb1   :  { %622 = vmatprep.mubr.bf16.mxu0 %v2916_v0  ;;  %2791 = vmatmul.mubr.msk.bf16.gmra.mrb[12].mxu1 %vm406_vm3, %v2879_v51  ;;  %v3276_v19 = vsel %vm353_vm0, 1.0, %v2917_v5 }
  0xb2   :  { %695 = vmatprep.mubr.bf16.mxu1 %v2916_v0 }
  0xb8   :  { %2793 = vmatmul.mubr.msk.bf16.vlgmr.msra.gmra.mrb[16].mxu0 %vm406_vm3, %v3209_v16 }
  0xb9   :  { %632 = vmatprep.mubr.bf16.mxu0 %v2916_v0  ;;  %2798 = vmatmul.mubr.msk.bf16.vlgmr.msra.gmra.mrb[16].mxu1 %vm406_vm3, %v3209_v16  ;;  %v2918_v16 = vmov 839922192  }
  0xba   :  { %705 = vmatprep.mubr.bf16.mxu1 %v2916_v0  ;;  %v782_v20 = vunpack.c.l.s4 %v2918_v16 }
  0xbc   :  { %v783_v21 = vunpack.c.0.s8 %v782_v20 }
  0xbe   :  { %v3295_v22 = vsub.s32 %v783_v21, %v3117_v60 }
  0xc0   :  { %2794 = vmatmul.mubr.msk.bf16.gmra.mrb[20].mxu0 %vm406_vm3, %v3233_v32  ;;  %v799_v24 = vrot.slane %v791_v23, %v3295_v22  ;;  %v787_v39 = vrot.slane %v779_v7, %v3295_v22  ;;  %v811_v45 = vrot.slane %v803_v42, %v3295_v22  ;;  %v823_v46 = vrot.slane %v815_v33, %v3295_v22  ;;  %v863_v33 = vpop.permute.xlu0 %862 }
  0xc1   :  { %642 = vmatprep.mubr.bf16.mxu0 %v2916_v0  ;;  %2799 = vmatmul.mubr.msk.bf16.gmra.mrb[20].mxu1 %vm406_vm3, %v3233_v32  ;;  %v847_v18 = vrot.slane %v839_v3, %v3295_v22 }
  0xc2   :  { %715 = vmatprep.mubr.bf16.mxu1 %v2916_v0  ;;  %v3299_v29 = vcombine.low %v787_v39, %v799_v24  ;;  %v3310_v38 = vcombine.low %v811_v45, %v823_v46  ;;  %v871_v46 = vrot.slane %v863_v33, %v3295_v22 }
  0xc8   :  { %2795 = vmatmul.mubr.msk.bf16.gmra.mrb[24].mxu0 %vm406_vm3, %v3245_v48 }
  0xc9   :  { %652 = vmatprep.mubr.bf16.mxu0 %v2916_v0  ;;  %2800 = vmatmul.mubr.msk.bf16.gmra.mrb[24].mxu1 %vm406_vm3, %v3245_v48 }
  0xca   :  { %725 = vmatprep.mubr.bf16.mxu1 %v2916_v0 }
  0xd0   :  { %2796 = vmatmul.mubr.msk.bf16.gmra.mrb[28].mxu0 %vm406_vm3, %v2879_v51 }
  0xd1   :  { %1073 = vmatprep.mubr.bf16.mxu0 %v2916_v0  ;;  %2801 = vmatmul.mubr.msk.bf16.gmra.mrb[28].mxu1 %vm406_vm3, %v2879_v51  ;;  %v827_v51 = vpop.permute.xlu1 %826 }
  0xd2   :  { %1186 = vmatprep.mubr.bf16.mxu1 %v2916_v0  ;;  %v835_v17 = vrot.slane %v827_v51, %v3295_v22 }
  0xd5   :  { %v851_v7 = vpop.permute.xlu1 %850 }
  0xd6   :  { %v859_v45 = vrot.slane %v851_v7, %v3295_v22 }
 0x16b   :  { %v478_v25 = vpop.f32.mrb[0].mxu0 }
 0x16c   :  { %v480_v26 = vpop.f32.mrb[1].mxu0  ;;  %v551_v27 = vpop.f32.mrb[0].mxu1 }
 0x16d   :  { %v482_v28 = vpop.f32.mrb[2].mxu0  ;;  %v553_v30 = vpop.f32.mrb[1].mxu1 }
 0x16e   :  { %v736_v31 = vpack.c.bf16 %v482_v28, %v478_v25  ;;  %v484_v32 = vpop.f32.mrb[3].mxu0  ;;  %v555_v34 = vpop.f32.mrb[2].mxu1 }
 0x16f   :  { %v737_v35 = vpack.c.bf16 %v484_v32, %v480_v26  ;;  %v738_v40 = vpack.c.bf16 %v555_v34, %v551_v27  ;;  %v557_v41 = vpop.f32.mrb[3].mxu1  ;;  %v3322_v27 = vcombine.low %v835_v17, %v847_v18 }
 0x170   :  { %v896_v36 = vadd.bf16 %v3299_v29, %v736_v31  ;;  %v739_v44 = vpack.c.bf16 %v557_v41, %v553_v30 }
 0x171   :  { %v897_v43 = vadd.bf16 %v3299_v29, %v737_v35  ;;  %v898_v47 = vadd.bf16 %v3299_v29, %v738_v40 }
 0x172   :  { %v899_v48 = vadd.bf16 %v3299_v29, %v739_v44  ;;  %v928_v37 = vmax.bf16 %v2916_v0, %v896_v36 }
 0x173   :  { %v488_v49 = vpop.f32.mrb[4].mxu0  ;;  %v929_v50 = vmax.bf16 %v2916_v0, %v897_v43  ;;  %v930_v56 = vmax.bf16 %v2916_v0, %v898_v47 }
 0x174   :  { %v490_v52 = vpop.f32.mrb[5].mxu0  ;;  %v561_v53 = vpop.f32.mrb[4].mxu1  ;;  %v931_v55 = vmax.bf16 %v2916_v0, %v899_v48 }
 0x175   :  { %v492_v54 = vpop.f32.mrb[6].mxu0  ;;  %1041 = vmatprep.subr.bf16.mxu0 %v929_v50  ;;  %v563_v61 = vpop.f32.mrb[5].mxu1 }
 0x176   :  { %v744_v62 = vpack.c.bf16 %v492_v54, %v488_v49  ;;  %v494_v2 = vpop.f32.mrb[7].mxu0  ;;  %1042 = vmatpush1.bf16.msra.mxu0 %v928_v37  ;;  %v565_v4 = vpop.f32.mrb[6].mxu1  ;;  %1154 = vmatprep.subr.bf16.mxu1 %v931_v55  ;;  %v3334_v55 = vcombine.low %v859_v45, %v871_v46 }
 0x177   :  { %v745_v8 = vpack.c.bf16 %v494_v2, %v490_v52  ;;  %v746_v12 = vpack.c.bf16 %v565_v4, %v561_v53  ;;  %v567_v13 = vpop.f32.mrb[7].mxu1  ;;  %1155 = vmatpush1.bf16.msra.mxu1 %v930_v56 }
 0x178   :  { %v904_v11 = vadd.bf16 %v3310_v38, %v744_v62  ;;  %v747_v15 = vpack.c.bf16 %v567_v13, %v563_v61 }
 0x179   :  { %v905_v14 = vadd.bf16 %v3310_v38, %v745_v8  ;;  %v906_v16 = vadd.bf16 %v3310_v38, %v746_v12 }
 0x17a   :  { %v907_v20 = vadd.bf16 %v3310_v38, %v747_v15  ;;  %v936_v24 = vmax.bf16 %v2916_v0, %v904_v11 }
 0x17b   :  { %v498_v21 = vpop.f32.mrb[8].mxu0  ;;  %v937_v23 = vmax.bf16 %v2916_v0, %v905_v14  ;;  %v938_v28 = vmax.bf16 %v2916_v0, %v906_v16 }
 0x17c   :  { %v500_v39 = vpop.f32.mrb[9].mxu0  ;;  %v571_v25 = vpop.f32.mrb[8].mxu1  ;;  %v939_v26 = vmax.bf16 %v2916_v0, %v907_v20 }
 0x17d   :  { %v502_v42 = vpop.f32.mrb[10].mxu0  ;;  %1043 = vmatprep.subr.bf16.mxu0 %v937_v23  ;;  %v573_v30 = vpop.f32.mrb[9].mxu1 }
 0x17e   :  { %v752_v31 = vpack.c.bf16 %v502_v42, %v498_v21  ;;  %v504_v32 = vpop.f32.mrb[11].mxu0  ;;  %1044 = vmatpush1.bf16.msra.mxu0 %v936_v24  ;;  %v575_v34 = vpop.f32.mrb[10].mxu1  ;;  %1156 = vmatprep.subr.bf16.mxu1 %v939_v26 }
 0x17f   :  { %v753_v35 = vpack.c.bf16 %v504_v32, %v500_v39  ;;  %v754_v40 = vpack.c.bf16 %v575_v34, %v571_v25  ;;  %v577_v41 = vpop.f32.mrb[11].mxu1  ;;  %1157 = vmatpush1.bf16.msra.mxu1 %v938_v28  ;;  %v3347_v39 = vld [vmem:[%s3840_s5] sm:$0xff]  }
 0x180   :  { %v912_v36 = vadd.bf16 %v3322_v27, %v752_v31  ;;  %v755_v44 = vpack.c.bf16 %v577_v41, %v573_v30 }
 0x181   :  { %v913_v43 = vadd.bf16 %v3322_v27, %v753_v35  ;;  %v914_v47 = vadd.bf16 %v3322_v27, %v754_v40 }
 0x182   :  { %v915_v48 = vadd.bf16 %v3322_v27, %v755_v44  ;;  %v944_v51 = vmax.bf16 %v2916_v0, %v912_v36 }
 0x183   :  { %v508_v49 = vpop.f32.mrb[12].mxu0  ;;  %v945_v50 = vmax.bf16 %v2916_v0, %v913_v43  ;;  %v946_v56 = vmax.bf16 %v2916_v0, %v914_v47 }
 0x184   :  { %v510_v37 = vpop.f32.mrb[13].mxu0  ;;  %v581_v52 = vpop.f32.mrb[12].mxu1  ;;  %v947_v54 = vmax.bf16 %v2916_v0, %v915_v48 }
 0x185   :  { %v512_v53 = vpop.f32.mrb[14].mxu0  ;;  %1045 = vmatprep.subr.bf16.mxu0 %v945_v50  ;;  %v583_v61 = vpop.f32.mrb[13].mxu1 }
 0x186   :  { %v760_v62 = vpack.c.bf16 %v512_v53, %v508_v49  ;;  %v514_v2 = vpop.f32.mrb[15].mxu0  ;;  %1046 = vmatpush1.bf16.msra.mxu0 %v944_v51  ;;  %v585_v3 = vpop.f32.mrb[14].mxu1  ;;  %1158 = vmatprep.subr.bf16.mxu1 %v947_v54 }
 0x187   :  { %v761_v4 = vpack.c.bf16 %v514_v2, %v510_v37  ;;  %v762_v11 = vpack.c.bf16 %v585_v3, %v581_v52  ;;  %v587_v12 = vpop.f32.mrb[15].mxu1  ;;  %1159 = vmatpush1.bf16.msra.mxu1 %v946_v56 }
 0x188   :  { %v920_v8 = vadd.bf16 %v3334_v55, %v760_v62  ;;  %v763_v14 = vpack.c.bf16 %v587_v12, %v583_v61 }
 0x189   :  { %v921_v13 = vadd.bf16 %v3334_v55, %v761_v4  ;;  %v922_v15 = vadd.bf16 %v3334_v55, %v762_v11 }
 0x18a   :  { %v923_v17 = vadd.bf16 %v3334_v55, %v763_v14  ;;  %v952_v20 = vmax.bf16 %v2916_v0, %v920_v8 }
 0x18b   :  { %v624_v18 = vpop.f32.mrb[16].mxu0  ;;  %v953_v16 = vmax.bf16 %v2916_v0, %v921_v13  ;;  %v954_v25 = vmax.bf16 %v2916_v0, %v922_v15 }
 0x18c   :  { %v626_v21 = vpop.f32.mrb[17].mxu0  ;;  %v697_v23 = vpop.f32.mrb[16].mxu1  ;;  %v955_v24 = vmax.bf16 %v2916_v0, %v923_v17 }
 0x18d   :  { %v628_v7 = vpop.f32.mrb[18].mxu0  ;;  %1047 = vmatprep.subr.bf16.mxu0 %v953_v16  ;;  %v699_v42 = vpop.f32.mrb[17].mxu1 }
 0x18e   :  { %v740_v26 = vpack.c.bf16 %v628_v7, %v624_v18  ;;  %v630_v28 = vpop.f32.mrb[19].mxu0  ;;  %1048 = vmatpush1.bf16.msra.mxu0 %v952_v20  ;;  %v701_v30 = vpop.f32.mrb[18].mxu1  ;;  %1160 = vmatprep.subr.bf16.mxu1 %v955_v24 }
 0x18f   :  { %v741_v31 = vpack.c.bf16 %v630_v28, %v626_v21  ;;  %v742_v33 = vpack.c.bf16 %v701_v30, %v697_v23  ;;  %v703_v34 = vpop.f32.mrb[19].mxu1  ;;  %1161 = vmatpush1.bf16.msra.mxu1 %v954_v25 }
 0x190   :  { %v900_v32 = vadd.bf16 %v3299_v29, %v740_v26  ;;  %v743_v36 = vpack.c.bf16 %v703_v34, %v699_v42 }
 0x191   :  { %v901_v35 = vadd.bf16 %v3299_v29, %v741_v31  ;;  %2814 = vmatmul.mubr.msk.bf16.vlgmr.msra.gmra.mrb[32].mxu0 %vm1016_vm2, %v3347_v39  ;;  %v902_v40 = vadd.bf16 %v3299_v29, %v742_v33 }
 0x192   :  { %1083 = vmatprep.mubr.bf16.mxu0 %v2916_v0  ;;  %v903_v41 = vadd.bf16 %v3299_v29, %v743_v36  ;;  %2822 = vmatmul.mubr.msk.bf16.vlgmr.msra.gmra.mrb[32].mxu1 %vm1016_vm2, %v3347_v39  ;;  %v932_v45 = vmax.bf16 %v2916_v0, %v900_v32  ;;  %v3366_v29 = vld [vmem:[%s3840_s5 + $0x8] sm:$0xff]  }
 0x193   :  { %v634_v43 = vpop.f32.mrb[20].mxu0  ;;  %v933_v44 = vmax.bf16 %v2916_v0, %v901_v35  ;;  %1196 = vmatprep.mubr.bf16.mxu1 %v2916_v0  ;;  %v934_v50 = vmax.bf16 %v2916_v0, %v902_v40 }
 0x194   :  { %v636_v46 = vpop.f32.mrb[21].mxu0  ;;  %v707_v47 = vpop.f32.mrb[20].mxu1  ;;  %v935_v49 = vmax.bf16 %v2916_v0, %v903_v41 }
 0x195   :  { %v638_v48 = vpop.f32.mrb[22].mxu0  ;;  %1267 = vmatprep.subr.bf16.mxu0 %v933_v44  ;;  %v709_v51 = vpop.f32.mrb[21].mxu1 }
 0x196   :  { %v748_v37 = vpack.c.bf16 %v638_v48, %v634_v43  ;;  %v640_v52 = vpop.f32.mrb[23].mxu0  ;;  %1268 = vmatpush1.bf16.msra.mxu0 %v932_v45  ;;  %v711_v53 = vpop.f32.mrb[22].mxu1  ;;  %1380 = vmatprep.subr.bf16.mxu1 %v935_v49 }
 0x197   :  { %v749_v54 = vpack.c.bf16 %v640_v52, %v636_v46  ;;  %v750_v61 = vpack.c.bf16 %v711_v53, %v707_v47  ;;  %v713_v62 = vpop.f32.mrb[23].mxu1  ;;  %1381 = vmatpush1.bf16.msra.mxu1 %v934_v50 }
 0x198   :  { %v908_v56 = vadd.bf16 %v3310_v38, %v748_v37  ;;  %v751_v3 = vpack.c.bf16 %v713_v62, %v709_v51 }
 0x199   :  { %v909_v2 = vadd.bf16 %v3310_v38, %v749_v54  ;;  %2815 = vmatmul.mubr.msk.bf16.gmra.mrb[36].mxu0 %vm1016_vm2, %v3366_v29  ;;  %v910_v4 = vadd.bf16 %v3310_v38, %v750_v61 }
 0x19a   :  { %1093 = vmatprep.mubr.bf16.mxu0 %v2916_v0  ;;  %v911_v8 = vadd.bf16 %v3310_v38, %v751_v3  ;;  %2823 = vmatmul.mubr.msk.bf16.gmra.mrb[36].mxu1 %vm1016_vm2, %v3366_v29  ;;  %v940_v13 = vmax.bf16 %v2916_v0, %v908_v56  ;;  %v3385_v38 = vld [vmem:[%s3840_s5 + $0x10] sm:$0xff]   ;;  %v2884_v3 = vld [vmem:[%s3840_s5 + $0x20] sm:$0xff]  }
 0x19b   :  { %v644_v11 = vpop.f32.mrb[24].mxu0  ;;  %v941_v12 = vmax.bf16 %v2916_v0, %v909_v2  ;;  %1206 = vmatprep.mubr.bf16.mxu1 %v2916_v0  ;;  %v942_v16 = vmax.bf16 %v2916_v0, %v910_v4 }
 0x19c   :  { %v646_v14 = vpop.f32.mrb[25].mxu0  ;;  %v717_v15 = vpop.f32.mrb[24].mxu1  ;;  %v943_v18 = vmax.bf16 %v2916_v0, %v911_v8  ;;  %v2886_v8 = vld [vmem:[%s3840_s5 + $0x30] sm:$0xff]  }
 0x19d   :  { %v648_v17 = vpop.f32.mrb[26].mxu0  ;;  %1269 = vmatprep.subr.bf16.mxu0 %v941_v12  ;;  %v719_v20 = vpop.f32.mrb[25].mxu1 }
 0x19e   :  { %v756_v21 = vpack.c.bf16 %v648_v17, %v644_v11  ;;  %v650_v23 = vpop.f32.mrb[27].mxu0  ;;  %1270 = vmatpush1.bf16.msra.mxu0 %v940_v13  ;;  %v721_v7 = vpop.f32.mrb[26].mxu1  ;;  %1382 = vmatprep.subr.bf16.mxu1 %v943_v18  ;;  %v2887_v11 = vld [vmem:[%s3840_s5 + $0x38] sm:$0xff]  }
 0x19f   :  { %v757_v24 = vpack.c.bf16 %v650_v23, %v646_v14  ;;  %v758_v42 = vpack.c.bf16 %v721_v7, %v717_v15  ;;  %v723_v26 = vpop.f32.mrb[27].mxu1  ;;  %1383 = vmatpush1.bf16.msra.mxu1 %v942_v16 }
 0x1a0   :  { %v916_v25 = vadd.bf16 %v3322_v27, %v756_v21  ;;  %v759_v30 = vpack.c.bf16 %v723_v26, %v719_v20 }
 0x1a1   :  { %v917_v28 = vadd.bf16 %v3322_v27, %v757_v24  ;;  %2816 = vmatmul.mubr.msk.bf16.gmra.mrb[40].mxu0 %vm1016_vm2, %v3385_v38  ;;  %v918_v31 = vadd.bf16 %v3322_v27, %v758_v42 }
 0x1a2   :  { %1103 = vmatprep.mubr.bf16.mxu0 %v2916_v0  ;;  %v919_v32 = vadd.bf16 %v3322_v27, %v759_v30  ;;  %2824 = vmatmul.mubr.msk.bf16.gmra.mrb[40].mxu1 %vm1016_vm2, %v3385_v38  ;;  %v948_v35 = vmax.bf16 %v2916_v0, %v916_v25  ;;  %v3404_v27 = vld [vmem:[%s3840_s5 + $0x18] sm:$0xff]  }
 0x1a3   :  { %v654_v33 = vpop.f32.mrb[28].mxu0  ;;  %v949_v34 = vmax.bf16 %v2916_v0, %v917_v28  ;;  %1216 = vmatprep.mubr.bf16.mxu1 %v2916_v0  ;;  %v950_v44 = vmax.bf16 %v2916_v0, %v918_v31 }
 0x1a4   :  { %v656_v36 = vpop.f32.mrb[29].mxu0  ;;  %v727_v40 = vpop.f32.mrb[28].mxu1  ;;  %v951_v43 = vmax.bf16 %v2916_v0, %v919_v32 }
 0x1a5   :  { %v658_v41 = vpop.f32.mrb[30].mxu0  ;;  %1271 = vmatprep.subr.bf16.mxu0 %v949_v34  ;;  %v729_v45 = vpop.f32.mrb[29].mxu1 }
 0x1a6   :  { %v764_v46 = vpack.c.bf16 %v658_v41, %v654_v33  ;;  %v660_v47 = vpop.f32.mrb[31].mxu0  ;;  %1272 = vmatpush1.bf16.msra.mxu0 %v948_v35  ;;  %v731_v48 = vpop.f32.mrb[30].mxu1  ;;  %1384 = vmatprep.subr.bf16.mxu1 %v951_v43 }
 0x1a7   :  { %v765_v49 = vpack.c.bf16 %v660_v47, %v656_v36  ;;  %v766_v51 = vpack.c.bf16 %v731_v48, %v727_v40  ;;  %v733_v37 = vpop.f32.mrb[31].mxu1  ;;  %1385 = vmatpush1.bf16.msra.mxu1 %v950_v44 }
 0x1a8   :  { %v924_v50 = vadd.bf16 %v3334_v55, %v764_v46  ;;  %v767_v53 = vpack.c.bf16 %v733_v37, %v729_v45 }
 0x1a9   :  { %v925_v52 = vadd.bf16 %v3334_v55, %v765_v49  ;;  %2817 = vmatmul.mubr.msk.bf16.gmra.mrb[44].mxu0 %vm1016_vm2, %v3404_v27  ;;  %v926_v54 = vadd.bf16 %v3334_v55, %v766_v51 }
 0x1aa   :  { %1113 = vmatprep.mubr.bf16.mxu0 %v2916_v0  ;;  %v927_v56 = vadd.bf16 %v3334_v55, %v767_v53  ;;  %2825 = vmatmul.mubr.msk.bf16.gmra.mrb[44].mxu1 %vm1016_vm2, %v3404_v27  ;;  %v956_v62 = vmax.bf16 %v2916_v0, %v924_v50  ;;  %v2885_v55 = vld [vmem:[%s3840_s5 + $0x28] sm:$0xff]  }
 0x1ab   :  { %v957_v61 = vmax.bf16 %v2916_v0, %v925_v52  ;;  %1226 = vmatprep.mubr.bf16.mxu1 %v2916_v0  ;;  %v958_v4 = vmax.bf16 %v2916_v0, %v926_v54 }
 0x1ac   :  { %v959_v2 = vmax.bf16 %v2916_v0, %v927_v56 }
 0x1ad   :  { %1273 = vmatprep.subr.bf16.mxu0 %v957_v61 }
 0x1ae   :  { %1274 = vmatpush1.bf16.msra.mxu0 %v956_v62  ;;  %1386 = vmatprep.subr.bf16.mxu1 %v959_v2 }
 0x1af   :  { %1387 = vmatpush1.bf16.msra.mxu1 %v958_v4 }
 0x1b1   :  { %2818 = vmatmul.mubr.msk.bf16.gmra.mrb[48].mxu0 %vm1016_vm2, %v2884_v3 }
 0x1b2   :  { %1123 = vmatprep.mubr.bf16.mxu0 %v2916_v0  ;;  %2826 = vmatmul.mubr.msk.bf16.gmra.mrb[48].mxu1 %vm1016_vm2, %v2884_v3 }
 0x1b3   :  { %1236 = vmatprep.mubr.bf16.mxu1 %v2916_v0 }
 0x1b9   :  { %2819 = vmatmul.mubr.msk.bf16.gmra.mrb[52].mxu0 %vm1016_vm2, %v2885_v55 }
 0x1ba   :  { %1133 = vmatprep.mubr.bf16.mxu0 %v2916_v0  ;;  %2827 = vmatmul.mubr.msk.bf16.gmra.mrb[52].mxu1 %vm1016_vm2, %v2885_v55 }
 0x1bb   :  { %1246 = vmatprep.mubr.bf16.mxu1 %v2916_v0 }
 0x1c1   :  { %2820 = vmatmul.mubr.msk.bf16.gmra.mrb[56].mxu0 %vm1016_vm2, %v2886_v8 }
 0x1c2   :  { %1143 = vmatprep.mubr.bf16.mxu0 %v2916_v0  ;;  %2828 = vmatmul.mubr.msk.bf16.gmra.mrb[56].mxu1 %vm1016_vm2, %v2886_v8 }
 0x1c3   :  { %1256 = vmatprep.mubr.bf16.mxu1 %v2916_v0 }
 0x1c9   :  { %2821 = vmatmul.mubr.msk.bf16.gmra.mrb[60].mxu0 %vm1016_vm2, %v2887_v11 }
 0x1ca   :  { %1299 = vmatprep.mubr.bf16.mxu0 %v2916_v0  ;;  %2829 = vmatmul.mubr.msk.bf16.gmra.mrb[60].mxu1 %vm1016_vm2, %v2887_v11 }
 0x1cb   :  { %1412 = vmatprep.mubr.bf16.mxu1 %v2916_v0 }
 0x1d1   :  { %2830 = vmatmul.mubr.msk.bf16.vlgmr.msra.gmra.mrb[64].mxu0 %vm1016_vm2, %v3347_v39 }
 0x1d2   :  { %1309 = vmatprep.mubr.bf16.mxu0 %v2916_v0  ;;  %2838 = vmatmul.mubr.msk.bf16.vlgmr.msra.gmra.mrb[64].mxu1 %vm1016_vm2, %v3347_v39  ;;  %v1576_v39 = vpop.permute.xlu1 %1575 }
 0x1d3   :  { %1422 = vmatprep.mubr.bf16.mxu1 %v2916_v0  ;;  %v1584_v12 = vrot.slane %v1576_v39, %v3295_v22 }
 0x1d6   :  { %v1600_v15 = vpop.permute.xlu1 %1599 }
 0x1d7   :  { %v1608_v32 = vrot.slane %v1600_v15, %v3295_v22 }
 0x1d9   :  { %2831 = vmatmul.mubr.msk.bf16.gmra.mrb[68].mxu0 %vm1016_vm2, %v3366_v29 }
 0x1da   :  { %1319 = vmatprep.mubr.bf16.mxu0 %v2916_v0  ;;  %2839 = vmatmul.mubr.msk.bf16.gmra.mrb[68].mxu1 %vm1016_vm2, %v3366_v29  ;;  %v1588_v29 = vpop.permute.xlu0 %1587  ;;  %v1624_v41 = vpop.permute.xlu1 %1623 }
 0x1db   :  { %1432 = vmatprep.mubr.bf16.mxu1 %v2916_v0  ;;  %v1596_v13 = vrot.slane %v1588_v29, %v3295_v22 }
 0x1dd   :  { %v3491_v16 = vcombine.low %v1584_v12, %v1596_v13 }
 0x1de   :  { %v1612_v7 = vpop.permute.xlu0 %1611  ;;  %v1648_v29 = vpop.permute.xlu1 %1647 }
 0x1df   :  { %v1620_v33 = vrot.slane %v1612_v7, %v3295_v22 }
 0x1e1   :  { %2832 = vmatmul.mubr.msk.bf16.gmra.mrb[72].mxu0 %vm1016_vm2, %v3385_v38  ;;  %v3502_v47 = vcombine.low %v1608_v32, %v1620_v33  ;;  %v1656_v32 = vrot.slane %v1648_v29, %v3295_v22 }
 0x1e2   :  { %1329 = vmatprep.mubr.bf16.mxu0 %v2916_v0  ;;  %2840 = vmatmul.mubr.msk.bf16.gmra.mrb[72].mxu1 %vm1016_vm2, %v3385_v38  ;;  %v1636_v37 = vpop.permute.xlu0 %1635 }
 0x1e3   :  { %1442 = vmatprep.mubr.bf16.mxu1 %v2916_v0  ;;  %v1644_v4 = vrot.slane %v1636_v37, %v3295_v22 }
 0x1e6   :  { %v1660_v7 = vpop.permute.xlu0 %1659 }
 0x1e7   :  { %v1668_v33 = vrot.slane %v1660_v7, %v3295_v22 }
 0x1e9   :  { %2833 = vmatmul.mubr.msk.bf16.gmra.mrb[76].mxu0 %vm1016_vm2, %v3404_v27 }
 0x1ea   :  { %1339 = vmatprep.mubr.bf16.mxu0 %v2916_v0  ;;  %2841 = vmatmul.mubr.msk.bf16.gmra.mrb[76].mxu1 %vm1016_vm2, %v3404_v27 }
 0x1eb   :  { %1452 = vmatprep.mubr.bf16.mxu1 %v2916_v0 }
 0x1f1   :  { %2834 = vmatmul.mubr.msk.bf16.gmra.mrb[80].mxu0 %vm1016_vm2, %v2884_v3 }
 0x1f2   :  { %1349 = vmatprep.mubr.bf16.mxu0 %v2916_v0  ;;  %2842 = vmatmul.mubr.msk.bf16.gmra.mrb[80].mxu1 %vm1016_vm2, %v2884_v3  ;;  %v1632_v3 = vrot.slane %v1624_v41, %v3295_v22  ;;  %v1672_v41 = vpop.permute.xlu1 %1671 }
 0x1f3   :  { %1462 = vmatprep.mubr.bf16.mxu1 %v2916_v0 }
 0x1f9   :  { %2835 = vmatmul.mubr.msk.bf16.gmra.mrb[84].mxu0 %vm1016_vm2, %v2885_v55 }
 0x1fa   :  { %1359 = vmatprep.mubr.bf16.mxu0 %v2916_v0  ;;  %2843 = vmatmul.mubr.msk.bf16.gmra.mrb[84].mxu1 %vm1016_vm2, %v2885_v55 }
 0x1fb   :  { %1472 = vmatprep.mubr.bf16.mxu1 %v2916_v0 }
 0x201   :  { %2836 = vmatmul.mubr.msk.bf16.gmra.mrb[88].mxu0 %vm1016_vm2, %v2886_v8 }
 0x202   :  { %1369 = vmatprep.mubr.bf16.mxu0 %v2916_v0  ;;  %2844 = vmatmul.mubr.msk.bf16.gmra.mrb[88].mxu1 %vm1016_vm2, %v2886_v8 }
 0x203   :  { %1482 = vmatprep.mubr.bf16.mxu1 %v2916_v0 }
 0x209   :  { %2837 = vmatmul.mubr.msk.bf16.gmra.mrb[92].mxu0 %vm1016_vm2, %v2887_v11 }
 0x20a   :  { %2005 = vmatprep.mubr.bf16.mxu0 %v2916_v0  ;;  %2845 = vmatmul.mubr.msk.bf16.gmra.mrb[92].mxu1 %vm1016_vm2, %v2887_v11 }
 0x20b   :  { %2078 = vmatprep.mubr.bf16.mxu1 %v2916_v0 }
 0x264   :  { %v1075_v14 = vpop.f32.mrb[32].mxu0 }
 0x265   :  { %v1077_v17 = vpop.f32.mrb[33].mxu0  ;;  %v1188_v18 = vpop.f32.mrb[32].mxu1 }
 0x266   :  { %v1079_v38 = vpop.f32.mrb[34].mxu0  ;;  %v1190_v20 = vpop.f32.mrb[33].mxu1 }
 0x267   :  { %v1493_v21 = vpack.c.bf16 %v1079_v38, %v1075_v14  ;;  %v1081_v23 = vpop.f32.mrb[35].mxu0  ;;  %v1192_v24 = vpop.f32.mrb[34].mxu1 }
 0x268   :  { %v1494_v25 = vpack.c.bf16 %v1081_v23, %v1077_v17  ;;  %v1495_v26 = vpack.c.bf16 %v1192_v24, %v1188_v18  ;;  %v1194_v28 = vpop.f32.mrb[35].mxu1  ;;  %v3514_v18 = vcombine.low %v1632_v3, %v1644_v4  ;;  %v1680_v4 = vrot.slane %v1672_v41, %v3295_v22 }
 0x269   :  { %v1813_v42 = vadd.bf16 %v3491_v16, %v1493_v21  ;;  %v1496_v31 = vpack.c.bf16 %v1194_v28, %v1190_v20 }
 0x26a   :  { %v1814_v30 = vadd.bf16 %v3491_v16, %v1494_v25  ;;  %v1815_v34 = vadd.bf16 %v3491_v16, %v1495_v26 }
 0x26b   :  { %v1816_v35 = vadd.bf16 %v3491_v16, %v1496_v31  ;;  %v1877_v43 = vmax.bf16 %v2916_v0, %v1813_v42 }
 0x26c   :  { %v1085_v36 = vpop.f32.mrb[36].mxu0  ;;  %v1878_v40 = vmax.bf16 %v2916_v0, %v1814_v30  ;;  %v1879_v48 = vmax.bf16 %v2916_v0, %v1815_v34 }
 0x26d   :  { %v1087_v27 = vpop.f32.mrb[37].mxu0  ;;  %v1198_v44 = vpop.f32.mrb[36].mxu1  ;;  %v1880_v46 = vmax.bf16 %v2916_v0, %v1816_v35 }
 0x26e   :  { %v1089_v45 = vpop.f32.mrb[38].mxu0  ;;  %1973 = vmatprep.subr.bf16.mxu0 %v1878_v40  ;;  %v1200_v49 = vpop.f32.mrb[37].mxu1 }
 0x26f   :  { %v1501_v50 = vpack.c.bf16 %v1089_v45, %v1085_v36  ;;  %v1091_v51 = vpop.f32.mrb[39].mxu0  ;;  %1974 = vmatpush1.bf16.msra.mxu0 %v1877_v43  ;;  %v1202_v52 = vpop.f32.mrb[38].mxu1  ;;  %2046 = vmatprep.subr.bf16.mxu1 %v1880_v46 }
 0x270   :  { %v1502_v53 = vpack.c.bf16 %v1091_v51, %v1087_v27  ;;  %v1503_v56 = vpack.c.bf16 %v1202_v52, %v1198_v44  ;;  %v1204_v61 = vpop.f32.mrb[39].mxu1  ;;  %2047 = vmatpush1.bf16.msra.mxu1 %v1879_v48  ;;  %v3526_v48 = vcombine.low %v1656_v32, %v1668_v33  ;;  %v1684_v52 = vpop.permute.xlu0 %1683 }
 0x271   :  { %v1821_v54 = vadd.bf16 %v3502_v47, %v1501_v50  ;;  %v1504_v2 = vpack.c.bf16 %v1204_v61, %v1200_v49 }
 0x272   :  { %v1822_v62 = vadd.bf16 %v3502_v47, %v1502_v53  ;;  %v1823_v55 = vadd.bf16 %v3502_v47, %v1503_v56 }
 0x273   :  { %v1824_v8 = vadd.bf16 %v3502_v47, %v1504_v2  ;;  %v1885_v12 = vmax.bf16 %v2916_v0, %v1821_v54 }
 0x274   :  { %v1095_v11 = vpop.f32.mrb[40].mxu0  ;;  %v1886_v39 = vmax.bf16 %v2916_v0, %v1822_v62  ;;  %v1887_v38 = vmax.bf16 %v2916_v0, %v1823_v55  ;;  %v1692_v55 = vrot.slane %v1684_v52, %v3295_v22 }
 0x275   :  { %v1097_v13 = vpop.f32.mrb[41].mxu0  ;;  %v1208_v14 = vpop.f32.mrb[40].mxu1  ;;  %v1888_v17 = vmax.bf16 %v2916_v0, %v1824_v8 }
 0x276   :  { %v1099_v15 = vpop.f32.mrb[42].mxu0  ;;  %1975 = vmatprep.subr.bf16.mxu0 %v1886_v39  ;;  %v1210_v20 = vpop.f32.mrb[41].mxu1 }
 0x277   :  { %v1509_v21 = vpack.c.bf16 %v1099_v15, %v1095_v11  ;;  %v1101_v23 = vpop.f32.mrb[43].mxu0  ;;  %1976 = vmatpush1.bf16.msra.mxu0 %v1885_v12  ;;  %v1212_v24 = vpop.f32.mrb[42].mxu1  ;;  %2048 = vmatprep.subr.bf16.mxu1 %v1888_v17 }
 0x278   :  { %v1510_v25 = vpack.c.bf16 %v1101_v23, %v1097_v13  ;;  %v1511_v26 = vpack.c.bf16 %v1212_v24, %v1208_v14  ;;  %v1214_v28 = vpop.f32.mrb[43].mxu1  ;;  %2049 = vmatpush1.bf16.msra.mxu1 %v1887_v38  ;;  %v1696_v12 = vpop.permute.xlu1 %1695 }
 0x279   :  { %v1829_v42 = vadd.bf16 %v3514_v18, %v1509_v21  ;;  %v1512_v31 = vpack.c.bf16 %v1214_v28, %v1210_v20  ;;  %v3538_v20 = vcombine.low %v1680_v4, %v1692_v55 }
 0x27a   :  { %v1830_v30 = vadd.bf16 %v3514_v18, %v1510_v25  ;;  %v1831_v34 = vadd.bf16 %v3514_v18, %v1511_v26  ;;  %v1708_v25 = vpop.permute.xlu0 %1707 }
 0x27b   :  { %v1832_v35 = vadd.bf16 %v3514_v18, %v1512_v31  ;;  %v1893_v43 = vmax.bf16 %v2916_v0, %v1829_v42 }
 0x27c   :  { %v1105_v36 = vpop.f32.mrb[44].mxu0  ;;  %v1894_v40 = vmax.bf16 %v2916_v0, %v1830_v30  ;;  %v1895_v49 = vmax.bf16 %v2916_v0, %v1831_v34  ;;  %v1704_v34 = vrot.slane %v1696_v12, %v3295_v22 }
 0x27d   :  { %v1107_v27 = vpop.f32.mrb[45].mxu0  ;;  %v1218_v44 = vpop.f32.mrb[44].mxu1  ;;  %v1896_v46 = vmax.bf16 %v2916_v0, %v1832_v35  ;;  %v1716_v35 = vrot.slane %v1708_v25, %v3295_v22 }
 0x27e   :  { %v1109_v45 = vpop.f32.mrb[46].mxu0  ;;  %1977 = vmatprep.subr.bf16.mxu0 %v1894_v40  ;;  %v1220_v50 = vpop.f32.mrb[45].mxu1 }
 0x27f   :  { %v1517_v51 = vpack.c.bf16 %v1109_v45, %v1105_v36  ;;  %v1111_v37 = vpop.f32.mrb[47].mxu0  ;;  %1978 = vmatpush1.bf16.msra.mxu0 %v1893_v43  ;;  %v1222_v53 = vpop.f32.mrb[46].mxu1  ;;  %2050 = vmatprep.subr.bf16.mxu1 %v1896_v46 }
 0x280   :  { %v1518_v54 = vpack.c.bf16 %v1111_v37, %v1107_v27  ;;  %v1519_v61 = vpack.c.bf16 %v1222_v53, %v1218_v44  ;;  %v1224_v62 = vpop.f32.mrb[47].mxu1  ;;  %2051 = vmatpush1.bf16.msra.mxu1 %v1895_v49  ;;  %v1720_v27 = vpop.permute.xlu1 %1719 }
 0x281   :  { %v1837_v56 = vadd.bf16 %v3526_v48, %v1517_v51  ;;  %v1520_v3 = vpack.c.bf16 %v1224_v62, %v1220_v50  ;;  %v3550_v51 = vcombine.low %v1704_v34, %v1716_v35 }
 0x282   :  { %v1838_v2 = vadd.bf16 %v3526_v48, %v1518_v54  ;;  %v1839_v8 = vadd.bf16 %v3526_v48, %v1519_v61 }
 0x283   :  { %v1840_v11 = vadd.bf16 %v3526_v48, %v1520_v3  ;;  %v1901_v13 = vmax.bf16 %v2916_v0, %v1837_v56  ;;  %v1732_v56 = vpop.permute.xlu0 %1731 }
 0x284   :  { %v1115_v39 = vpop.f32.mrb[48].mxu0  ;;  %v1902_v29 = vmax.bf16 %v2916_v0, %v1838_v2  ;;  %v1903_v21 = vmax.bf16 %v2916_v0, %v1839_v8 }
 0x285   :  { %v1117_v14 = vpop.f32.mrb[49].mxu0  ;;  %v1228_v15 = vpop.f32.mrb[48].mxu1  ;;  %v1904_v38 = vmax.bf16 %v2916_v0, %v1840_v11  ;;  %v1728_v11 = vrot.slane %v1720_v27, %v3295_v22 }
 0x286   :  { %v1119_v17 = vpop.f32.mrb[50].mxu0  ;;  %1979 = vmatprep.subr.bf16.mxu0 %v1902_v29  ;;  %v1230_v23 = vpop.f32.mrb[49].mxu1 }
 0x287   :  { %v1525_v7 = vpack.c.bf16 %v1119_v17, %v1115_v39  ;;  %v1121_v24 = vpop.f32.mrb[51].mxu0  ;;  %1980 = vmatpush1.bf16.msra.mxu0 %v1901_v13  ;;  %v1232_v42 = vpop.f32.mrb[50].mxu1  ;;  %2052 = vmatprep.subr.bf16.mxu1 %v1904_v38  ;;  %v1740_v39 = vrot.slane %v1732_v56, %v3295_v22 }
 0x288   :  { %v1526_v26 = vpack.c.bf16 %v1121_v24, %v1117_v14  ;;  %v1527_v30 = vpack.c.bf16 %v1232_v42, %v1228_v15  ;;  %v1234_v31 = vpop.f32.mrb[51].mxu1  ;;  %2053 = vmatpush1.bf16.msra.mxu1 %v1903_v21  ;;  %v1744_v15 = vpop.permute.xlu1 %1743 }
 0x289   :  { %v1845_v28 = vadd.bf16 %v3538_v20, %v1525_v7  ;;  %v1528_v33 = vpack.c.bf16 %v1234_v31, %v1230_v23  ;;  %v3562_v24 = vcombine.low %v1728_v11, %v1740_v39 }
 0x28a   :  { %v1846_v32 = vadd.bf16 %v3538_v20, %v1526_v26  ;;  %v1847_v36 = vadd.bf16 %v3538_v20, %v1527_v30  ;;  %v1756_v30 = vpop.permute.xlu0 %1755 }
 0x28b   :  { %v1848_v40 = vadd.bf16 %v3538_v20, %v1528_v33  ;;  %v1909_v44 = vmax.bf16 %v2916_v0, %v1845_v28 }
 0x28c   :  { %v1125_v41 = vpop.f32.mrb[52].mxu0  ;;  %v1910_v43 = vmax.bf16 %v2916_v0, %v1846_v32  ;;  %v1911_v37 = vmax.bf16 %v2916_v0, %v1847_v36 }
 0x28d   :  { %v1127_v45 = vpop.f32.mrb[53].mxu0  ;;  %v1238_v46 = vpop.f32.mrb[52].mxu1  ;;  %v1912_v50 = vmax.bf16 %v2916_v0, %v1848_v40 }
 0x28e   :  { %v1129_v49 = vpop.f32.mrb[54].mxu0  ;;  %1981 = vmatprep.subr.bf16.mxu0 %v1910_v43  ;;  %v1240_v52 = vpop.f32.mrb[53].mxu1  ;;  %v1764_v43 = vrot.slane %v1756_v30, %v3295_v22 }
 0x28f   :  { %v1533_v53 = vpack.c.bf16 %v1129_v49, %v1125_v41  ;;  %v1131_v54 = vpop.f32.mrb[55].mxu0  ;;  %1982 = vmatpush1.bf16.msra.mxu0 %v1909_v44  ;;  %v1242_v61 = vpop.f32.mrb[54].mxu1  ;;  %2054 = vmatprep.subr.bf16.mxu1 %v1912_v50  ;;  %v1752_v41 = vrot.slane %v1744_v15, %v3295_v22 }
 0x290   :  { %v1534_v62 = vpack.c.bf16 %v1131_v54, %v1127_v45  ;;  %v1535_v3 = vpack.c.bf16 %v1242_v61, %v1238_v46  ;;  %v1244_v4 = vpop.f32.mrb[55].mxu1  ;;  %2055 = vmatpush1.bf16.msra.mxu1 %v1911_v37 }
 0x291   :  { %v1853_v2 = vadd.bf16 %v3550_v51, %v1533_v53  ;;  %v1536_v8 = vpack.c.bf16 %v1244_v4, %v1240_v52  ;;  %v3574_v54 = vcombine.low %v1752_v41, %v1764_v43 }
 0x292   :  { %v1854_v55 = vadd.bf16 %v3550_v51, %v1534_v62  ;;  %v1855_v29 = vadd.bf16 %v3550_v51, %v1535_v3 }
 0x293   :  { %v1856_v12 = vadd.bf16 %v3550_v51, %v1536_v8  ;;  %v1917_v17 = vmax.bf16 %v2916_v0, %v1853_v2 }
 0x294   :  { %v1135_v13 = vpop.f32.mrb[56].mxu0  ;;  %v1918_v14 = vmax.bf16 %v2916_v0, %v1854_v55  ;;  %v1919_v25 = vmax.bf16 %v2916_v0, %v1855_v29 }
 0x295   :  { %v1137_v38 = vpop.f32.mrb[57].mxu0  ;;  %v1248_v21 = vpop.f32.mrb[56].mxu1  ;;  %v1920_v7 = vmax.bf16 %v2916_v0, %v1856_v12 }
 0x296   :  { %v1139_v23 = vpop.f32.mrb[58].mxu0  ;;  %1983 = vmatprep.subr.bf16.mxu0 %v1918_v14  ;;  %v1250_v42 = vpop.f32.mrb[57].mxu1 }
 0x297   :  { %v1541_v26 = vpack.c.bf16 %v1139_v23, %v1135_v13  ;;  %v1141_v28 = vpop.f32.mrb[59].mxu0  ;;  %1984 = vmatpush1.bf16.msra.mxu0 %v1917_v17  ;;  %v1252_v31 = vpop.f32.mrb[58].mxu1  ;;  %2056 = vmatprep.subr.bf16.mxu1 %v1920_v7 }
 0x298   :  { %v1542_v32 = vpack.c.bf16 %v1141_v28, %v1137_v38  ;;  %v1543_v34 = vpack.c.bf16 %v1252_v31, %v1248_v21  ;;  %v1254_v35 = vpop.f32.mrb[59].mxu1  ;;  %2057 = vmatpush1.bf16.msra.mxu1 %v1919_v25  ;;  %v3587_v25 = vld [vmem:[%s3841_s7] sm:$0xff]  }
 0x299   :  { %v1861_v33 = vadd.bf16 %v3562_v24, %v1541_v26  ;;  %v1544_v40 = vpack.c.bf16 %v1254_v35, %v1250_v42 }
 0x29a   :  { %v1862_v36 = vadd.bf16 %v3562_v24, %v1542_v32  ;;  %v1863_v27 = vadd.bf16 %v3562_v24, %v1543_v34 }
 0x29b   :  { %v1864_v44 = vadd.bf16 %v3562_v24, %v1544_v40  ;;  %v1925_v49 = vmax.bf16 %v2916_v0, %v1861_v33 }
 0x29c   :  { %v1145_v45 = vpop.f32.mrb[60].mxu0  ;;  %v1926_v46 = vmax.bf16 %v2916_v0, %v1862_v36  ;;  %v1927_v56 = vmax.bf16 %v2916_v0, %v1863_v27 }
 0x29d   :  { %v1147_v50 = vpop.f32.mrb[61].mxu0  ;;  %v1258_v37 = vpop.f32.mrb[60].mxu1  ;;  %v1928_v53 = vmax.bf16 %v2916_v0, %v1864_v44 }
 0x29e   :  { %v1149_v52 = vpop.f32.mrb[62].mxu0  ;;  %1985 = vmatprep.subr.bf16.mxu0 %v1926_v46  ;;  %v1260_v61 = vpop.f32.mrb[61].mxu1 }
 0x29f   :  { %v1549_v62 = vpack.c.bf16 %v1149_v52, %v1145_v45  ;;  %v1151_v2 = vpop.f32.mrb[63].mxu0  ;;  %1986 = vmatpush1.bf16.msra.mxu0 %v1925_v49  ;;  %v1262_v3 = vpop.f32.mrb[62].mxu1  ;;  %2058 = vmatprep.subr.bf16.mxu1 %v1928_v53  ;;  %v3604_v52 = vld [vmem:[%s3841_s7 + $0x8] sm:$0xff]  }
 0x2a0   :  { %v1550_v4 = vpack.c.bf16 %v1151_v2, %v1147_v50  ;;  %v1551_v8 = vpack.c.bf16 %v1262_v3, %v1258_v37  ;;  %v1264_v11 = vpop.f32.mrb[63].mxu1  ;;  %2059 = vmatpush1.bf16.msra.mxu1 %v1927_v56 }
 0x2a1   :  { %v1869_v55 = vadd.bf16 %v3574_v54, %v1549_v62  ;;  %v1552_v29 = vpack.c.bf16 %v1264_v11, %v1260_v61 }
 0x2a2   :  { %v1870_v39 = vadd.bf16 %v3574_v54, %v1550_v4  ;;  %v1871_v12 = vadd.bf16 %v3574_v54, %v1551_v8 }
 0x2a3   :  { %v1872_v13 = vadd.bf16 %v3574_v54, %v1552_v29  ;;  %v1933_v17 = vmax.bf16 %v2916_v0, %v1869_v55 }
 0x2a4   :  { %v1301_v14 = vpop.f32.mrb[64].mxu0  ;;  %v1934_v15 = vmax.bf16 %v2916_v0, %v1870_v39  ;;  %v1935_v42 = vmax.bf16 %v2916_v0, %v1871_v12 }
 0x2a5   :  { %v1303_v38 = vpop.f32.mrb[65].mxu0  ;;  %v1414_v21 = vpop.f32.mrb[64].mxu1  ;;  %v1936_v7 = vmax.bf16 %v2916_v0, %v1872_v13 }
 0x2a6   :  { %v1305_v23 = vpop.f32.mrb[66].mxu0  ;;  %1987 = vmatprep.subr.bf16.mxu0 %v1934_v15  ;;  %v1416_v26 = vpop.f32.mrb[65].mxu1 }
 0x2a7   :  { %v1497_v28 = vpack.c.bf16 %v1305_v23, %v1301_v14  ;;  %v1307_v30 = vpop.f32.mrb[67].mxu0  ;;  %1988 = vmatpush1.bf16.msra.mxu0 %v1933_v17  ;;  %v1418_v31 = vpop.f32.mrb[66].mxu1  ;;  %2060 = vmatprep.subr.bf16.mxu1 %v1936_v7  ;;  %v3621_v23 = vld [vmem:[%s3841_s7 + $0x10] sm:$0xff]  }
 0x2a8   :  { %v1498_v32 = vpack.c.bf16 %v1307_v30, %v1303_v38  ;;  %v1499_v34 = vpack.c.bf16 %v1418_v31, %v1414_v21  ;;  %v1420_v35 = vpop.f32.mrb[67].mxu1  ;;  %2061 = vmatpush1.bf16.msra.mxu1 %v1935_v42 }
 0x2a9   :  { %v1817_v33 = vadd.bf16 %v3491_v16, %v1497_v28  ;;  %v1500_v40 = vpack.c.bf16 %v1420_v35, %v1416_v26 }
 0x2aa   :  { %v1818_v36 = vadd.bf16 %v3491_v16, %v1498_v32  ;;  %2006 = vmatmul.mubr.bf16.vlgmr.msra.gmra.mrb[96].mxu0 %v3587_v25  ;;  %v1819_v41 = vadd.bf16 %v3491_v16, %v1499_v34 }
 0x2ab   :  { %2015 = vmatprep.mubr.bf16.mxu0 %v2916_v0  ;;  %v1820_v43 = vadd.bf16 %v3491_v16, %v1500_v40  ;;  %2079 = vmatmul.mubr.bf16.vlgmr.msra.gmra.mrb[96].mxu1 %v3587_v25  ;;  %v1881_v45 = vmax.bf16 %v2916_v0, %v1817_v33 }
 0x2ac   :  { %v1311_v27 = vpop.f32.mrb[68].mxu0  ;;  %v1882_v44 = vmax.bf16 %v2916_v0, %v1818_v36  ;;  %2088 = vmatprep.mubr.bf16.mxu1 %v2916_v0  ;;  %v1883_v16 = vmax.bf16 %v2916_v0, %v1819_v41 }
 0x2ad   :  { %v1313_v46 = vpop.f32.mrb[69].mxu0  ;;  %v1424_v49 = vpop.f32.mrb[68].mxu1  ;;  %v1884_v37 = vmax.bf16 %v2916_v0, %v1820_v43 }
 0x2ae   :  { %v1315_v50 = vpop.f32.mrb[70].mxu0  ;;  %2119 = vmatprep.subr.bf16.mxu0 %v1882_v44  ;;  %v1426_v53 = vpop.f32.mrb[69].mxu1 }
 0x2af   :  { %v1505_v56 = vpack.c.bf16 %v1315_v50, %v1311_v27  ;;  %v1317_v61 = vpop.f32.mrb[71].mxu0  ;;  %2120 = vmatpush1.bf16.msra.mxu0 %v1881_v45  ;;  %v1428_v62 = vpop.f32.mrb[70].mxu1  ;;  %2192 = vmatprep.subr.bf16.mxu1 %v1884_v37  ;;  %v3638_v50 = vld [vmem:[%s3841_s7 + $0x18] sm:$0xff]  }
 0x2b0   :  { %v1506_v2 = vpack.c.bf16 %v1317_v61, %v1313_v46  ;;  %v1507_v4 = vpack.c.bf16 %v1428_v62, %v1424_v49  ;;  %v1430_v55 = vpop.f32.mrb[71].mxu1  ;;  %2193 = vmatpush1.bf16.msra.mxu1 %v1883_v16 }
 0x2b1   :  { %v1825_v3 = vadd.bf16 %v3502_v47, %v1505_v56  ;;  %v1508_v11 = vpack.c.bf16 %v1430_v55, %v1426_v53 }
 0x2b2   :  { %v1826_v8 = vadd.bf16 %v3502_v47, %v1506_v2  ;;  %2016 = vmatmul.mubr.bf16.gmra.mrb[100].mxu0 %v3604_v52  ;;  %v1827_v39 = vadd.bf16 %v3502_v47, %v1507_v4 }
 0x2b3   :  { %2025 = vmatprep.mubr.bf16.mxu0 %v2916_v0  ;;  %v1828_v29 = vadd.bf16 %v3502_v47, %v1508_v11  ;;  %2089 = vmatmul.mubr.bf16.gmra.mrb[100].mxu1 %v3604_v52  ;;  %v1889_v14 = vmax.bf16 %v2916_v0, %v1825_v3 }
 0x2b4   :  { %v1321_v12 = vpop.f32.mrb[72].mxu0  ;;  %v1890_v13 = vmax.bf16 %v2916_v0, %v1826_v8  ;;  %2098 = vmatprep.mubr.bf16.mxu1 %v2916_v0  ;;  %v1891_v47 = vmax.bf16 %v2916_v0, %v1827_v39 }
 0x2b5   :  { %v1323_v15 = vpop.f32.mrb[73].mxu0  ;;  %v1434_v17 = vpop.f32.mrb[72].mxu1  ;;  %v1892_v21 = vmax.bf16 %v2916_v0, %v1828_v29 }
 0x2b6   :  { %v1325_v38 = vpop.f32.mrb[74].mxu0  ;;  %2121 = vmatprep.subr.bf16.mxu0 %v1890_v13  ;;  %v1436_v7 = vpop.f32.mrb[73].mxu1 }
 0x2b7   :  { %v1513_v42 = vpack.c.bf16 %v1325_v38, %v1321_v12  ;;  %v1327_v26 = vpop.f32.mrb[75].mxu0  ;;  %2122 = vmatpush1.bf16.msra.mxu0 %v1889_v14  ;;  %v1438_v28 = vpop.f32.mrb[74].mxu1  ;;  %2194 = vmatprep.subr.bf16.mxu1 %v1892_v21 }
 0x2b8   :  { %v1514_v30 = vpack.c.bf16 %v1327_v26, %v1323_v15  ;;  %v1515_v32 = vpack.c.bf16 %v1438_v28, %v1434_v17  ;;  %v1440_v33 = vpop.f32.mrb[75].mxu1  ;;  %2195 = vmatpush1.bf16.msra.mxu1 %v1891_v47 }
 0x2b9   :  { %v1833_v31 = vadd.bf16 %v3514_v18, %v1513_v42  ;;  %v1516_v35 = vpack.c.bf16 %v1440_v33, %v1436_v7 }
 0x2ba   :  { %v1834_v34 = vadd.bf16 %v3514_v18, %v1514_v30  ;;  %2026 = vmatmul.mubr.bf16.gmra.mrb[104].mxu0 %v3621_v23  ;;  %v1835_v36 = vadd.bf16 %v3514_v18, %v1515_v32 }
 0x2bb   :  { %2035 = vmatprep.mubr.bf16.mxu0 %v2916_v0  ;;  %v1836_v40 = vadd.bf16 %v3514_v18, %v1516_v35  ;;  %2099 = vmatmul.mubr.bf16.gmra.mrb[104].mxu1 %v3621_v23  ;;  %v1897_v27 = vmax.bf16 %v2916_v0, %v1833_v31 }
 0x2bc   :  { %v1331_v41 = vpop.f32.mrb[76].mxu0  ;;  %v1898_v43 = vmax.bf16 %v2916_v0, %v1834_v34  ;;  %2108 = vmatprep.mubr.bf16.mxu1 %v2916_v0  ;;  %v1899_v18 = vmax.bf16 %v2916_v0, %v1835_v36 }
 0x2bd   :  { %v1333_v44 = vpop.f32.mrb[77].mxu0  ;;  %v1444_v45 = vpop.f32.mrb[76].mxu1  ;;  %v1900_v49 = vmax.bf16 %v2916_v0, %v1836_v40 }
 0x2be   :  { %v1335_v46 = vpop.f32.mrb[78].mxu0  ;;  %2123 = vmatprep.subr.bf16.mxu0 %v1898_v43  ;;  %v1446_v37 = vpop.f32.mrb[77].mxu1 }
 0x2bf   :  { %v1521_v16 = vpack.c.bf16 %v1335_v46, %v1331_v41  ;;  %v1337_v53 = vpop.f32.mrb[79].mxu0  ;;  %2124 = vmatpush1.bf16.msra.mxu0 %v1897_v27  ;;  %v1448_v56 = vpop.f32.mrb[78].mxu1  ;;  %2196 = vmatprep.subr.bf16.mxu1 %v1900_v49 }
 0x2c0   :  { %v1522_v61 = vpack.c.bf16 %v1337_v53, %v1333_v44  ;;  %v1523_v2 = vpack.c.bf16 %v1448_v56, %v1444_v45  ;;  %v1450_v3 = vpop.f32.mrb[79].mxu1  ;;  %2197 = vmatpush1.bf16.msra.mxu1 %v1899_v18 }
 0x2c1   :  { %v1841_v62 = vadd.bf16 %v3526_v48, %v1521_v16  ;;  %v1524_v55 = vpack.c.bf16 %v1450_v3, %v1446_v37 }
 0x2c2   :  { %v1842_v4 = vadd.bf16 %v3526_v48, %v1522_v61  ;;  %2036 = vmatmul.mubr.bf16.gmra.mrb[108].mxu0 %v3638_v50  ;;  %v1843_v8 = vadd.bf16 %v3526_v48, %v1523_v2 }
 0x2c3   :  { %2151 = vmatprep.mubr.bf16.mxu0 %v2916_v0  ;;  %v1844_v11 = vadd.bf16 %v3526_v48, %v1524_v55  ;;  %2109 = vmatmul.mubr.bf16.gmra.mrb[108].mxu1 %v3638_v50  ;;  %v1905_v12 = vmax.bf16 %v2916_v0, %v1841_v62 }
 0x2c4   :  { %v1341_v39 = vpop.f32.mrb[80].mxu0  ;;  %v1906_v29 = vmax.bf16 %v2916_v0, %v1842_v4  ;;  %2224 = vmatprep.mubr.bf16.mxu1 %v2916_v0  ;;  %v1907_v38 = vmax.bf16 %v2916_v0, %v1843_v8 }
 0x2c5   :  { %v1343_v13 = vpop.f32.mrb[81].mxu0  ;;  %v1454_v14 = vpop.f32.mrb[80].mxu1  ;;  %v1908_v17 = vmax.bf16 %v2916_v0, %v1844_v11 }
 0x2c6   :  { %v1345_v15 = vpop.f32.mrb[82].mxu0  ;;  %2125 = vmatprep.subr.bf16.mxu0 %v1906_v29  ;;  %v1456_v21 = vpop.f32.mrb[81].mxu1 }
 0x2c7   :  { %v1529_v47 = vpack.c.bf16 %v1345_v15, %v1341_v39  ;;  %v1347_v48 = vpop.f32.mrb[83].mxu0  ;;  %2126 = vmatpush1.bf16.msra.mxu0 %v1905_v12  ;;  %v1458_v7 = vpop.f32.mrb[82].mxu1  ;;  %2198 = vmatprep.subr.bf16.mxu1 %v1908_v17 }
 0x2c8   :  { %v1530_v42 = vpack.c.bf16 %v1347_v48, %v1343_v13  ;;  %v1531_v28 = vpack.c.bf16 %v1458_v7, %v1454_v14  ;;  %v1460_v30 = vpop.f32.mrb[83].mxu1  ;;  %2199 = vmatpush1.bf16.msra.mxu1 %v1907_v38 }
 0x2c9   :  { %v1849_v26 = vadd.bf16 %v3538_v20, %v1529_v47  ;;  %v1532_v32 = vpack.c.bf16 %v1460_v30, %v1456_v21 }
 0x2ca   :  { %v1850_v31 = vadd.bf16 %v3538_v20, %v1530_v42  ;;  %v1851_v33 = vadd.bf16 %v3538_v20, %v1531_v28 }
 0x2cb   :  { %v1852_v34 = vadd.bf16 %v3538_v20, %v1532_v32  ;;  %v1913_v40 = vmax.bf16 %v2916_v0, %v1849_v26 }
 0x2cc   :  { %v1351_v35 = vpop.f32.mrb[84].mxu0  ;;  %v1914_v36 = vmax.bf16 %v2916_v0, %v1850_v31  ;;  %v1915_v45 = vmax.bf16 %v2916_v0, %v1851_v33 }
 0x2cd   :  { %v1353_v41 = vpop.f32.mrb[85].mxu0  ;;  %v1464_v43 = vpop.f32.mrb[84].mxu1  ;;  %v1916_v44 = vmax.bf16 %v2916_v0, %v1852_v34 }
 0x2ce   :  { %v1355_v27 = vpop.f32.mrb[86].mxu0  ;;  %2127 = vmatprep.subr.bf16.mxu0 %v1914_v36  ;;  %v1466_v46 = vpop.f32.mrb[85].mxu1 }
 0x2cf   :  { %v1537_v49 = vpack.c.bf16 %v1355_v27, %v1351_v35  ;;  %v1357_v18 = vpop.f32.mrb[87].mxu0  ;;  %2128 = vmatpush1.bf16.msra.mxu0 %v1913_v40  ;;  %v1468_v37 = vpop.f32.mrb[86].mxu1  ;;  %2200 = vmatprep.subr.bf16.mxu1 %v1916_v44 }
 0x2d0   :  { %v1538_v20 = vpack.c.bf16 %v1357_v18, %v1353_v41  ;;  %v1539_v53 = vpack.c.bf16 %v1468_v37, %v1464_v43  ;;  %v1470_v56 = vpop.f32.mrb[87].mxu1  ;;  %2201 = vmatpush1.bf16.msra.mxu1 %v1915_v45 }
 0x2d1   :  { %v1857_v16 = vadd.bf16 %v3550_v51, %v1537_v49  ;;  %v1540_v62 = vpack.c.bf16 %v1470_v56, %v1466_v46 }
 0x2d2   :  { %v1858_v61 = vadd.bf16 %v3550_v51, %v1538_v20  ;;  %v1859_v2 = vadd.bf16 %v3550_v51, %v1539_v53 }
 0x2d3   :  { %v1860_v3 = vadd.bf16 %v3550_v51, %v1540_v62  ;;  %v1921_v8 = vmax.bf16 %v2916_v0, %v1857_v16 }
 0x2d4   :  { %v1361_v4 = vpop.f32.mrb[88].mxu0  ;;  %v1922_v55 = vmax.bf16 %v2916_v0, %v1858_v61  ;;  %v1923_v13 = vmax.bf16 %v2916_v0, %v1859_v2 }
 0x2d5   :  { %v1363_v11 = vpop.f32.mrb[89].mxu0  ;;  %v1474_v39 = vpop.f32.mrb[88].mxu1  ;;  %v1924_v12 = vmax.bf16 %v2916_v0, %v1860_v3 }
 0x2d6   :  { %v1365_v29 = vpop.f32.mrb[90].mxu0  ;;  %2129 = vmatprep.subr.bf16.mxu0 %v1922_v55  ;;  %v1476_v14 = vpop.f32.mrb[89].mxu1 }
 0x2d7   :  { %v1545_v15 = vpack.c.bf16 %v1365_v29, %v1361_v4  ;;  %v1367_v17 = vpop.f32.mrb[91].mxu0  ;;  %2130 = vmatpush1.bf16.msra.mxu0 %v1921_v8  ;;  %v1478_v38 = vpop.f32.mrb[90].mxu1  ;;  %2202 = vmatprep.subr.bf16.mxu1 %v1924_v12 }
 0x2d8   :  { %v1546_v51 = vpack.c.bf16 %v1367_v17, %v1363_v11  ;;  %v1547_v47 = vpack.c.bf16 %v1478_v38, %v1474_v39  ;;  %v1480_v48 = vpop.f32.mrb[91].mxu1  ;;  %2203 = vmatpush1.bf16.msra.mxu1 %v1923_v13 }
 0x2d9   :  { %v1865_v21 = vadd.bf16 %v3562_v24, %v1545_v15  ;;  %v1548_v42 = vpack.c.bf16 %v1480_v48, %v1476_v14 }
 0x2da   :  { %v1866_v7 = vadd.bf16 %v3562_v24, %v1546_v51  ;;  %v1867_v26 = vadd.bf16 %v3562_v24, %v1547_v47 }
 0x2db   :  { %v1868_v28 = vadd.bf16 %v3562_v24, %v1548_v42  ;;  %v1929_v32 = vmax.bf16 %v2916_v0, %v1865_v21 }
 0x2dc   :  { %v1371_v30 = vpop.f32.mrb[92].mxu0  ;;  %v1930_v31 = vmax.bf16 %v2916_v0, %v1866_v7  ;;  %v1931_v40 = vmax.bf16 %v2916_v0, %v1867_v26 }
 0x2dd   :  { %v1373_v33 = vpop.f32.mrb[93].mxu0  ;;  %v1484_v34 = vpop.f32.mrb[92].mxu1  ;;  %v1932_v36 = vmax.bf16 %v2916_v0, %v1868_v28 }
 0x2de   :  { %v1375_v35 = vpop.f32.mrb[94].mxu0  ;;  %2131 = vmatprep.subr.bf16.mxu0 %v1930_v31  ;;  %v1486_v41 = vpop.f32.mrb[93].mxu1 }
 0x2df   :  { %v1553_v43 = vpack.c.bf16 %v1375_v35, %v1371_v30  ;;  %v1377_v27 = vpop.f32.mrb[95].mxu0  ;;  %2132 = vmatpush1.bf16.msra.mxu0 %v1929_v32  ;;  %v1488_v44 = vpop.f32.mrb[94].mxu1  ;;  %2204 = vmatprep.subr.bf16.mxu1 %v1932_v36 }
 0x2e0   :  { %v1554_v24 = vpack.c.bf16 %v1377_v27, %v1373_v33  ;;  %v1555_v46 = vpack.c.bf16 %v1488_v44, %v1484_v34  ;;  %v1490_v49 = vpop.f32.mrb[95].mxu1  ;;  %2205 = vmatpush1.bf16.msra.mxu1 %v1931_v40 }
 0x2e1   :  { %v1873_v45 = vadd.bf16 %v3574_v54, %v1553_v43  ;;  %v1556_v37 = vpack.c.bf16 %v1490_v49, %v1486_v41 }
 0x2e2   :  { %v1874_v18 = vadd.bf16 %v3574_v54, %v1554_v24  ;;  %v1875_v20 = vadd.bf16 %v3574_v54, %v1555_v46 }
 0x2e3   :  { %v1876_v16 = vadd.bf16 %v3574_v54, %v1556_v37  ;;  %v1937_v56 = vmax.bf16 %v2916_v0, %v1873_v45  ;;  %v2308_v54 = vpop.permute.xlu1 %2307 }
 0x2e4   :  { %v1938_v53 = vmax.bf16 %v2916_v0, %v1874_v18  ;;  %v1939_v62 = vmax.bf16 %v2916_v0, %v1875_v20 }
 0x2e5   :  { %v1940_v61 = vmax.bf16 %v2916_v0, %v1876_v16 }
 0x2e6   :  { %2133 = vmatprep.subr.bf16.mxu0 %v1938_v53 }
 0x2e7   :  { %2134 = vmatpush1.bf16.msra.mxu0 %v1937_v56  ;;  %2206 = vmatprep.subr.bf16.mxu1 %v1940_v61  ;;  %v2332_v4 = vpop.permute.xlu1 %2331 }
 0x2e8   :  { %2207 = vmatpush1.bf16.msra.mxu1 %v1939_v62  ;;  %v2340_v47 = vrot.slane %v2332_v4, %v3295_v22 }
 0x2ea   :  { %2152 = vmatmul.mubr.bf16.vlgmr.msra.gmra.mrb[112].mxu0 %v3587_v25 }
 0x2eb   :  { %2161 = vmatprep.mubr.bf16.mxu0 %v2916_v0  ;;  %2225 = vmatmul.mubr.bf16.vlgmr.msra.gmra.mrb[112].mxu1 %v3587_v25  ;;  %v2320_v25 = vpop.permute.xlu0 %2319  ;;  %v2356_v30 = vpop.permute.xlu1 %2355 }
 0x2ec   :  { %2234 = vmatprep.mubr.bf16.mxu1 %v2916_v0  ;;  %v2328_v2 = vrot.slane %v2320_v25, %v3295_v22  ;;  %v2364_v16 = vrot.slane %v2356_v30, %v3295_v22 }
 0x2ef   :  { %v2344_v13 = vpop.permute.xlu0 %2343  ;;  %v2380_v25 = vpop.permute.xlu1 %2379 }
 0x2f0   :  { %v2352_v48 = vrot.slane %v2344_v13, %v3295_v22 }
 0x2f2   :  { %2162 = vmatmul.mubr.bf16.gmra.mrb[116].mxu0 %v3604_v52  ;;  %v3714_v36 = vcombine.low %v2340_v47, %v2352_v48  ;;  %v2388_v47 = vrot.slane %v2380_v25, %v3295_v22 }
 0x2f3   :  { %2171 = vmatprep.mubr.bf16.mxu0 %v2916_v0  ;;  %2235 = vmatmul.mubr.bf16.gmra.mrb[116].mxu1 %v3604_v52  ;;  %v2316_v52 = vrot.slane %v2308_v54, %v3295_v22  ;;  %v2368_v44 = vpop.permute.xlu0 %2367 }
 0x2f4   :  { %2244 = vmatprep.mubr.bf16.mxu1 %v2916_v0  ;;  %v2376_v53 = vrot.slane %v2368_v44, %v3295_v22 }
 0x2f5   :  { %v3703_v11 = vcombine.low %v2316_v52, %v2328_v2 }
 0x2f7   :  { %v2392_v13 = vpop.permute.xlu0 %2391 }
 0x2f8   :  { %v2400_v48 = vrot.slane %v2392_v13, %v3295_v22 }
 0x2fa   :  { %2172 = vmatmul.mubr.bf16.gmra.mrb[120].mxu0 %v3621_v23 }
 0x2fb   :  { %2181 = vmatprep.mubr.bf16.mxu0 %v2916_v0  ;;  %2245 = vmatmul.mubr.bf16.gmra.mrb[120].mxu1 %v3621_v23 }
 0x2fc   :  { %2254 = vmatprep.mubr.bf16.mxu1 %v2916_v0 }
 0x302   :  { %2182 = vmatmul.mubr.bf16.gmra.mrb[124].mxu0 %v3638_v50 }
 0x303   :  { %2525 = vmatprep.mubr.bf16.mxu0 %v2916_v0  ;;  %2255 = vmatmul.mubr.bf16.gmra.mrb[124].mxu1 %v3638_v50 }
 0x304   :  { %2566 = vmatprep.mubr.bf16.mxu1 %v2916_v0 }
 0x37d   :  { %v2007_v3 = vpop.f32.mrb[96].mxu0 }
 0x37e   :  { %v2009_v55 = vpop.f32.mrb[97].mxu0  ;;  %v2080_v23 = vpop.f32.mrb[96].mxu1 }
 0x37f   :  { %v2011_v8 = vpop.f32.mrb[98].mxu0  ;;  %v2082_v39 = vpop.f32.mrb[97].mxu1 }
 0x380   :  { %v2265_v29 = vpack.c.bf16 %v2011_v8, %v2007_v3  ;;  %v2013_v12 = vpop.f32.mrb[99].mxu0  ;;  %v2084_v50 = vpop.f32.mrb[98].mxu1 }
 0x381   :  { %v2266_v14 = vpack.c.bf16 %v2013_v12, %v2009_v55  ;;  %v2267_v17 = vpack.c.bf16 %v2084_v50, %v2080_v23  ;;  %v2086_v38 = vpop.f32.mrb[99].mxu1  ;;  %v3726_v23 = vcombine.low %v2364_v16, %v2376_v53 }
 0x382   :  { %v2425_v15 = vadd.bf16 %v3703_v11, %v2265_v29  ;;  %v2268_v21 = vpack.c.bf16 %v2086_v38, %v2082_v39 }
 0x383   :  { %v2426_v51 = vadd.bf16 %v3703_v11, %v2266_v14  ;;  %v2427_v7 = vadd.bf16 %v3703_v11, %v2267_v17 }
 0x384   :  { %v2428_v42 = vadd.bf16 %v3703_v11, %v2268_v21  ;;  %v2457_v31 = vmax.bf16 %v2916_v0, %v2425_v15 }
 0x385   :  { %v2017_v26 = vpop.f32.mrb[100].mxu0  ;;  %v2458_v28 = vmax.bf16 %v2916_v0, %v2426_v51  ;;  %v2459_v40 = vmax.bf16 %v2916_v0, %v2427_v7 }
 0x386   :  { %v2019_v32 = vpop.f32.mrb[101].mxu0  ;;  %v2090_v33 = vpop.f32.mrb[100].mxu1  ;;  %v2460_v35 = vmax.bf16 %v2916_v0, %v2428_v42 }
 0x387   :  { %v2021_v34 = vpop.f32.mrb[102].mxu0  ;;  %2493 = vmatprep.subr.bf16.mxu0 %v2458_v28  ;;  %v2092_v41 = vpop.f32.mrb[101].mxu1 }
 0x388   :  { %v2273_v43 = vpack.c.bf16 %v2021_v34, %v2017_v26  ;;  %v2023_v27 = vpop.f32.mrb[103].mxu0  ;;  %2494 = vmatpush1.bf16.msra.mxu0 %v2457_v31  ;;  %v2094_v24 = vpop.f32.mrb[102].mxu1  ;;  %2534 = vmatprep.subr.bf16.mxu1 %v2460_v35  ;;  %v3738_v35 = vcombine.low %v2388_v47, %v2400_v48 }
 0x389   :  { %v2274_v45 = vpack.c.bf16 %v2023_v27, %v2019_v32  ;;  %v2275_v49 = vpack.c.bf16 %v2094_v24, %v2090_v33  ;;  %v2096_v18 = vpop.f32.mrb[103].mxu1  ;;  %2535 = vmatpush1.bf16.msra.mxu1 %v2459_v40 }
 0x38a   :  { %v2433_v46 = vadd.bf16 %v3714_v36, %v2273_v43  ;;  %v2276_v20 = vpack.c.bf16 %v2096_v18, %v2092_v41 }
 0x38b   :  { %v2434_v37 = vadd.bf16 %v3714_v36, %v2274_v45  ;;  %v2435_v56 = vadd.bf16 %v3714_v36, %v2275_v49 }
 0x38c   :  { %v2436_v61 = vadd.bf16 %v3714_v36, %v2276_v20  ;;  %v2465_v52 = vmax.bf16 %v2916_v0, %v2433_v46 }
 0x38d   :  { %v2027_v62 = vpop.f32.mrb[104].mxu0  ;;  %v2466_v54 = vmax.bf16 %v2916_v0, %v2434_v37  ;;  %v2467_v8 = vmax.bf16 %v2916_v0, %v2435_v56 }
 0x38e   :  { %v2029_v2 = vpop.f32.mrb[105].mxu0  ;;  %v2100_v3 = vpop.f32.mrb[104].mxu1  ;;  %v2468_v55 = vmax.bf16 %v2916_v0, %v2436_v61 }
 0x38f   :  { %v2031_v4 = vpop.f32.mrb[106].mxu0  ;;  %2495 = vmatprep.subr.bf16.mxu0 %v2466_v54  ;;  %v2102_v39 = vpop.f32.mrb[105].mxu1 }
 0x390   :  { %v2281_v29 = vpack.c.bf16 %v2031_v4, %v2027_v62  ;;  %v2033_v12 = vpop.f32.mrb[107].mxu0  ;;  %2496 = vmatpush1.bf16.msra.mxu0 %v2465_v52  ;;  %v2104_v50 = vpop.f32.mrb[106].mxu1  ;;  %2536 = vmatprep.subr.bf16.mxu1 %v2468_v55  ;;  %v3752_v62 = vld [vmem:[%s3842_s9] sm:$0xf] }
 0x391   :  { %v2282_v14 = vpack.c.bf16 %v2033_v12, %v2029_v2  ;;  %v2283_v17 = vpack.c.bf16 %v2104_v50, %v2100_v3  ;;  %v2106_v38 = vpop.f32.mrb[107].mxu1  ;;  %2537 = vmatpush1.bf16.msra.mxu1 %v2467_v8 }
 0x392   :  { %v2441_v15 = vadd.bf16 %v3726_v23, %v2281_v29  ;;  %v2284_v21 = vpack.c.bf16 %v2106_v38, %v2102_v39 }
 0x393   :  { %v2442_v51 = vadd.bf16 %v3726_v23, %v2282_v14  ;;  %v2443_v7 = vadd.bf16 %v3726_v23, %v2283_v17 }
 0x394   :  { %v2444_v42 = vadd.bf16 %v3726_v23, %v2284_v21  ;;  %v2473_v30 = vmax.bf16 %v2916_v0, %v2441_v15 }
 0x395   :  { %v2037_v26 = vpop.f32.mrb[108].mxu0  ;;  %v2474_v28 = vmax.bf16 %v2916_v0, %v2442_v51  ;;  %v2475_v40 = vmax.bf16 %v2916_v0, %v2443_v7 }
 0x396   :  { %v2039_v31 = vpop.f32.mrb[109].mxu0  ;;  %v2110_v32 = vpop.f32.mrb[108].mxu1  ;;  %v2476_v34 = vmax.bf16 %v2916_v0, %v2444_v42 }
 0x397   :  { %v2041_v33 = vpop.f32.mrb[110].mxu0  ;;  %2497 = vmatprep.subr.bf16.mxu0 %v2474_v28  ;;  %v2112_v22 = vpop.f32.mrb[109].mxu1 }
 0x398   :  { %v2289_v41 = vpack.c.bf16 %v2041_v33, %v2037_v26  ;;  %v2043_v43 = vpop.f32.mrb[111].mxu0  ;;  %2498 = vmatpush1.bf16.msra.mxu0 %v2473_v30  ;;  %v2114_v27 = vpop.f32.mrb[110].mxu1  ;;  %2538 = vmatprep.subr.bf16.mxu1 %v2476_v34 }
 0x399   :  { %v2290_v44 = vpack.c.bf16 %v2043_v43, %v2039_v31  ;;  %v2291_v45 = vpack.c.bf16 %v2114_v27, %v2110_v32  ;;  %v2116_v46 = vpop.f32.mrb[111].mxu1  ;;  %2539 = vmatpush1.bf16.msra.mxu1 %v2475_v40 }
 0x39a   :  { %v2449_v24 = vadd.bf16 %v3738_v35, %v2289_v41  ;;  %v2292_v18 = vpack.c.bf16 %v2116_v46, %v2112_v22 }
 0x39b   :  { %v2450_v49 = vadd.bf16 %v3738_v35, %v2290_v44  ;;  %v2451_v37 = vadd.bf16 %v3738_v35, %v2291_v45 }
 0x39c   :  { %v2452_v20 = vadd.bf16 %v3738_v35, %v2292_v18  ;;  %v2481_v53 = vmax.bf16 %v2916_v0, %v2449_v24 }
 0x39d   :  { %v2482_v16 = vmax.bf16 %v2916_v0, %v2450_v49  ;;  %v2483_v61 = vmax.bf16 %v2916_v0, %v2451_v37 }
 0x39e   :  { %v2484_v56 = vmax.bf16 %v2916_v0, %v2452_v20 }
 0x39f   :  { %2499 = vmatprep.subr.bf16.mxu0 %v2482_v16 }
 0x3a0   :  { %2500 = vmatpush1.bf16.msra.mxu0 %v2481_v53  ;;  %2540 = vmatprep.subr.bf16.mxu1 %v2484_v56 }
 0x3a1   :  { %2541 = vmatpush1.bf16.msra.mxu1 %v2483_v61 }
 0x3a3   :  { %2862 = vmatmul.mubr.msk.bf16.vlgmr.msra.gmra.mrb[128].mxu0 %vm1016_vm2, %v3752_v62 }
 0x3a4   :  { %2607 = vmatprep.mubr.bf16.mxu0 %v2916_v0  ;;  %2863 = vmatmul.mubr.msk.bf16.vlgmr.msra.gmra.mrb[128].mxu1 %vm1016_vm2, %v3752_v62 }
 0x3a5   :  { %2648 = vmatprep.mubr.bf16.mxu1 %v2916_v0 }
 0x3bd   :  { %v2153_v54 = vpop.f32.mrb[112].mxu0 }
 0x3be   :  { %v2155_v25 = vpop.f32.mrb[113].mxu0  ;;  %v2226_v52 = vpop.f32.mrb[112].mxu1 }
 0x3bf   :  { %v2157_v2 = vpop.f32.mrb[114].mxu0  ;;  %v2228_v3 = vpop.f32.mrb[113].mxu1 }
 0x3c0   :  { %v2269_v4 = vpack.c.bf16 %v2157_v2, %v2153_v54  ;;  %v2159_v55 = vpop.f32.mrb[115].mxu0  ;;  %v2230_v8 = vpop.f32.mrb[114].mxu1 }
 0x3c1   :  { %v2270_v39 = vpack.c.bf16 %v2159_v55, %v2155_v25  ;;  %v2271_v12 = vpack.c.bf16 %v2230_v8, %v2226_v52  ;;  %v2232_v13 = vpop.f32.mrb[115].mxu1 }
 0x3c2   :  { %v2429_v29 = vadd.bf16 %v3703_v11, %v2269_v4  ;;  %v2272_v14 = vpack.c.bf16 %v2232_v13, %v2228_v3 }
 0x3c3   :  { %v2430_v50 = vadd.bf16 %v3703_v11, %v2270_v39  ;;  %v2431_v15 = vadd.bf16 %v3703_v11, %v2271_v12 }
 0x3c4   :  { %v2432_v17 = vadd.bf16 %v3703_v11, %v2272_v14  ;;  %v2461_v21 = vmax.bf16 %v2916_v0, %v2429_v29 }
 0x3c5   :  { %v2163_v38 = vpop.f32.mrb[116].mxu0  ;;  %v2462_v51 = vmax.bf16 %v2916_v0, %v2430_v50  ;;  %v2463_v26 = vmax.bf16 %v2916_v0, %v2431_v15 }
 0x3c6   :  { %v2165_v47 = vpop.f32.mrb[117].mxu0  ;;  %v2236_v48 = vpop.f32.mrb[116].mxu1  ;;  %v2464_v42 = vmax.bf16 %v2916_v0, %v2432_v17 }
 0x3c7   :  { %v2167_v7 = vpop.f32.mrb[118].mxu0  ;;  %2575 = vmatprep.subr.bf16.mxu0 %v2462_v51  ;;  %v2238_v28 = vpop.f32.mrb[117].mxu1 }
 0x3c8   :  { %v2277_v30 = vpack.c.bf16 %v2167_v7, %v2163_v38  ;;  %v2169_v31 = vpop.f32.mrb[119].mxu0  ;;  %2576 = vmatpush1.bf16.msra.mxu0 %v2461_v21  ;;  %v2240_v32 = vpop.f32.mrb[118].mxu1  ;;  %2616 = vmatprep.subr.bf16.mxu1 %v2464_v42 }
 0x3c9   :  { %v2278_v11 = vpack.c.bf16 %v2169_v31, %v2165_v47  ;;  %v2279_v34 = vpack.c.bf16 %v2240_v32, %v2236_v48  ;;  %v2242_v40 = vpop.f32.mrb[119].mxu1  ;;  %2617 = vmatpush1.bf16.msra.mxu1 %v2463_v26 }
 0x3ca   :  { %v2437_v33 = vadd.bf16 %v3714_v36, %v2277_v30  ;;  %v2280_v41 = vpack.c.bf16 %v2242_v40, %v2238_v28  ;;  %v244_v40 = vmul.f32 %v3197_v9, %v3197_v9 }
 0x3cb   :  { %v2438_v22 = vadd.bf16 %v3714_v36, %v2278_v11  ;;  %v2439_v43 = vadd.bf16 %v3714_v36, %v2279_v34  ;;  %v243_v34 = vmul.f32 %v3174_v57, %v3174_v57 }
 0x3cc   :  { %v2440_v27 = vadd.bf16 %v3714_v36, %v2280_v41  ;;  %v2469_v45 = vmax.bf16 %v2916_v0, %v2437_v33 }
 0x3cd   :  { %v2173_v44 = vpop.f32.mrb[120].mxu0  ;;  %v2470_v24 = vmax.bf16 %v2916_v0, %v2438_v22  ;;  %v2471_v20 = vmax.bf16 %v2916_v0, %v2439_v43  ;;  %v259_v41 = vrot.slane %v243_v34, 1  ;;  %v260_v43 = vrot.slane %v244_v40, 1 }
 0x3ce   :  { %v2175_v46 = vpop.f32.mrb[121].mxu0  ;;  %v2246_v49 = vpop.f32.mrb[120].mxu1  ;;  %v2472_v37 = vmax.bf16 %v2916_v0, %v2440_v27 }
 0x3cf   :  { %v2177_v18 = vpop.f32.mrb[122].mxu0  ;;  %2577 = vmatprep.subr.bf16.mxu0 %v2470_v24  ;;  %v2248_v16 = vpop.f32.mrb[121].mxu1  ;;  %v275_v24 = vadd.f32 %v259_v41, %v243_v34 }
 0x3d0   :  { %v2285_v53 = vpack.c.bf16 %v2177_v18, %v2173_v44  ;;  %v2179_v56 = vpop.f32.mrb[123].mxu0  ;;  %2578 = vmatpush1.bf16.msra.mxu0 %v2469_v45  ;;  %v2250_v61 = vpop.f32.mrb[122].mxu1  ;;  %2618 = vmatprep.subr.bf16.mxu1 %v2472_v37  ;;  %v276_v45 = vadd.f32 %v260_v43, %v244_v40 }
 0x3d1   :  { %v2286_v36 = vpack.c.bf16 %v2179_v56, %v2175_v46  ;;  %v2287_v25 = vpack.c.bf16 %v2250_v61, %v2246_v49  ;;  %v2252_v52 = vpop.f32.mrb[123].mxu1  ;;  %2619 = vmatpush1.bf16.msra.mxu1 %v2471_v20  ;;  %v283_v49 = vadd.f32 0.0002, %v275_v24 }
 0x3d2   :  { %v2445_v54 = vadd.bf16 %v3726_v23, %v2285_v53  ;;  %v2288_v3 = vpack.c.bf16 %v2252_v52, %v2248_v16 }
 0x3d3   :  { %v2446_v2 = vadd.bf16 %v3726_v23, %v2286_v36  ;;  %v2447_v4 = vadd.bf16 %v3726_v23, %v2287_v25  ;;  %vm299_vm4 = vcmp.eq.f32.partialorder %v283_v49, inf  ;;  %vm301_vm7 = vcmp.eq.f32.partialorder %v283_v49, 0.0 }
 0x3d4   :  { %v2448_v55 = vadd.bf16 %v3726_v23, %v2288_v3  ;;  %v2477_v29 = vmax.bf16 %v2916_v0, %v2445_v54 }
 0x3d5   :  { %v2183_v8 = vpop.f32.mrb[124].mxu0  ;;  %v2478_v39 = vmax.bf16 %v2916_v0, %v2446_v2  ;;  %v2479_v15 = vmax.bf16 %v2916_v0, %v2447_v4  ;;  %v302_v2 = vand.u32 2147483648, %v283_v49 }
 0x3d6   :  { %v2185_v12 = vpop.f32.mrb[125].mxu0  ;;  %v2256_v13 = vpop.f32.mrb[124].mxu1  ;;  %v2480_v14 = vmax.bf16 %v2916_v0, %v2448_v55 }
 0x3d7   :  { %v2187_v50 = vpop.f32.mrb[126].mxu0  ;;  %2579 = vmatprep.subr.bf16.mxu0 %v2478_v39  ;;  %v2258_v17 = vpop.f32.mrb[125].mxu1 }
 0x3d8   :  { %v2293_v38 = vpack.c.bf16 %v2187_v50, %v2183_v8  ;;  %v2189_v51 = vpop.f32.mrb[127].mxu0  ;;  %2580 = vmatpush1.bf16.msra.mxu0 %v2477_v29  ;;  %v2260_v21 = vpop.f32.mrb[126].mxu1  ;;  %2620 = vmatprep.subr.bf16.mxu1 %v2480_v14 }
 0x3d9   :  { %v2294_v23 = vpack.c.bf16 %v2189_v51, %v2185_v12  ;;  %v2295_v48 = vpack.c.bf16 %v2260_v21, %v2256_v13  ;;  %v2262_v7 = vpop.f32.mrb[127].mxu1  ;;  %2621 = vmatpush1.bf16.msra.mxu1 %v2479_v15  ;;  %v2661_v39 = vpop.permute.xlu1 %2660  ;;  %v2919_v12 = vmov 1983009808  }
 0x3da   :  { %v2453_v47 = vadd.bf16 %v3738_v35, %v2293_v38  ;;  %v2296_v26 = vpack.c.bf16 %v2262_v7, %v2258_v17  ;;  %v2727_v13 = vunpack.c.l.s4 %v2919_v12  ;;  %v2666_v14 = vrot.slane %v2661_v39, %v3120_v63 }
 0x3db   :  { %v2454_v42 = vadd.bf16 %v3738_v35, %v2294_v23  ;;  %v2455_v28 = vadd.bf16 %v3738_v35, %v2295_v48 }
 0x3dc   :  { %v2456_v30 = vadd.bf16 %v3738_v35, %v2296_v26  ;;  %v2485_v32 = vmax.bf16 %v2916_v0, %v2453_v47  ;;  %v242_v35 = vmul.f32 %v3181_v59, %v3181_v59  ;;  %v284_v59 = vadd.f32 0.0002, %v276_v45 }
 0x3dd   :  { %v2486_v31 = vmax.bf16 %v2916_v0, %v2454_v42  ;;  %v2487_v33 = vmax.bf16 %v2916_v0, %v2455_v28  ;;  %v2728_v23 = vunpack.c.0.s8 %v2727_v13 }
 0x3de   :  { %v2488_v11 = vmax.bf16 %v2916_v0, %v2456_v30  ;;  %v245_v0 = vmul.f32 %v3177_v58, %v3177_v58  ;;  %v258_v22 = vrot.slane %v242_v35, 1  ;;  %vm306_vm1 = vcmp.eq.f32.partialorder %v284_v59, inf }
 0x3df   :  { %2581 = vmatprep.subr.bf16.mxu0 %v2486_v31  ;;  %v309_v52 = vand.u32 2147483648, %v284_v59  ;;  %vm308_vm8 = vcmp.eq.f32.partialorder %v284_v59, 0.0  ;;  %v2731_v41 = vsub.s32 %v2728_v23, %v3117_v60 }
 0x3e0   :  { %2582 = vmatpush1.bf16.msra.mxu0 %v2485_v32  ;;  %2622 = vmatprep.subr.bf16.mxu1 %v2488_v11  ;;  %v261_v27 = vrot.slane %v245_v0, 1  ;;  %v274_v44 = vadd.f32 %v258_v22, %v242_v35 }
 0x3e1   :  { %2623 = vmatpush1.bf16.msra.mxu1 %v2487_v33 }
 0x3e2   :  { %v282_v46 = vadd.f32 0.0002, %v274_v44 }
 0x3e3   :  { %2864 = vmatmul.mubr.msk.bf16.vlgmr.msra.gmra.mrb[132].mxu0 %vm1016_vm2, %v3752_v62 }
 0x3e4   :  { %2865 = vmatmul.mubr.msk.bf16.vlgmr.msra.gmra.mrb[132].mxu1 %vm1016_vm2, %v3752_v62  ;;  %v277_v62 = vadd.f32 %v261_v27, %v245_v0  ;;  %2908 = vrsqrt.f32 %v282_v46  ;;  %vm292_vm3 = vcmp.eq.f32.partialorder %v282_v46, inf  ;;  %vm294_vm5 = vcmp.eq.f32.partialorder %v282_v46, 0.0 }
 0x3e5   :  { %2910 = vrsqrt.f32 %v283_v49  ;;  %v295_v36 = vand.u32 2147483648, %v282_v46 }
 0x3e6   :  { %v285_v18 = vadd.f32 0.0002, %v277_v62  ;;  %2912 = vrsqrt.f32 %v284_v59 }
 0x3e8   :  { %2914 = vrsqrt.f32 %v285_v18  ;;  %vm313_vm6 = vcmp.eq.f32.partialorder %v285_v18, inf  ;;  %v316_v8 = vand.u32 2147483648, %v285_v18  ;;  %vm315_vm9 = vcmp.eq.f32.partialorder %v285_v18, 0.0 }
 0x3ee   :  { %v2909_v57 = vpop.eup %2908 }
 0x3ef   :  { %v2911_v9 = vpop.eup %2910  ;;  %v291_v20 = vmul.f32 %v2909_v57, %v282_v46 }
 0x3f0   :  { %v2913_v37 = vpop.eup %2912  ;;  %v298_v16 = vmul.f32 %v2911_v9, %v283_v49 }
 0x3f1   :  { %v305_v53 = vmul.f32 %v2913_v37, %v284_v59  ;;  %v293_v61 = vsel %vm292_vm3, %v282_v46, %v291_v20 }
 0x3f2   :  { %v2915_v58 = vpop.eup %2914  ;;  %v300_v54 = vsel %vm299_vm4, %v283_v49, %v298_v16  ;;  %v296_v3 = vsel %vm294_vm5, %v295_v36, %v293_v61 }
 0x3f3   :  { %v312_v56 = vmul.f32 %v2915_v58, %v285_v18  ;;  %v307_v25 = vsel %vm306_vm1, %v284_v59, %v305_v53  ;;  %v303_v55 = vsel %vm301_vm7, %v302_v2, %v300_v54  ;;  %vm346_vm10 = vcmp.le.f32.partialorder %v296_v3, 1.0 }
 0x3f4   :  { %v310_v29 = vsel %vm308_vm8, %v309_v52, %v307_v25  ;;  %vm347_vm11 = vcmp.le.f32.partialorder %v303_v55, 1.0  ;;  %v2770_v15 = vsel %vm346_vm10, 1.0, %v2917_v5  ;;  %v2695_v53 = vrot.slane %v3261_v6, 7 }
 0x3f5   :  { %v314_v4 = vsel %vm313_vm6, %v285_v18, %v312_v56  ;;  %vm348_vm12 = vcmp.le.f32.partialorder %v310_v29, 1.0  ;;  %v2771_v51 = vsel %vm347_vm11, 1.0, %v2917_v5  ;;  %v2691_v28 = vrot.slane %v2770_v15, 7 }
 0x3f6   :  { %v317_v50 = vsel %vm315_vm9, %v316_v8, %v314_v4  ;;  %v2772_v47 = vsel %vm348_vm12, 1.0, %v2917_v5  ;;  %v2692_v33 = vrot.slane %v2771_v51, 7  ;;  %v2696_v25 = vrot.slane %v3273_v1, 7 }
 0x3f7   :  { %vm349_vm13 = vcmp.le.f32.partialorder %v317_v50, 1.0  ;;  %v2693_v22 = vrot.slane %v2772_v47, 7  ;;  %v2697_v55 = vrot.slane %v3264_v10, 7  ;;  %v2698_v29 = vrot.slane %v3276_v19, 7 }
 0x3f8   :  { %v2773_v63 = vsel %vm349_vm13, 1.0, %v2917_v5 }
 0x3f9   :  { %v2694_v24 = vrot.slane %v2773_v63, 7 }
 0x476   :  { %v2527_v17 = vpop.f32.mrb[128].mxu0 }
 0x477   :  { %v2667_v38 = vadd.f32 %v2666_v14, %v2527_v17  ;;  %v2529_v21 = vpop.f32.mrb[129].mxu0  ;;  %v2568_v48 = vpop.f32.mrb[128].mxu1 }
 0x478   :  { %v2668_v7 = vadd.f32 %v2666_v14, %v2529_v21  ;;  %v2531_v42 = vpop.f32.mrb[130].mxu0  ;;  %v2669_v30 = vadd.f32 %v2666_v14, %v2568_v48  ;;  %v2570_v31 = vpop.f32.mrb[129].mxu1 }
 0x479   :  { %v2675_v26 = vmul.f32 %v2770_v15, %v2667_v38  ;;  %v2532_v32 = vpop.f32.mrb[131].mxu0  ;;  %v2670_v35 = vadd.f32 %v2666_v14, %v2570_v31  ;;  %v2572_v34 = vpop.f32.mrb[130].mxu1 }
 0x47a   :  { %v2676_v11 = vmul.f32 %v2771_v51, %v2668_v7  ;;  %v2677_v0 = vmul.f32 %v2772_v47, %v2669_v30  ;;  %v2573_v43 = vpop.f32.mrb[131].mxu1 }
 0x47b   :  { %v2708_v40 = vsel %vm2707_vm14, %v2675_v26, %v2691_v28  ;;  %v2678_v44 = vmul.f32 %v2773_v63, %v2670_v35 }
 0x47c   :  { %v2709_v27 = vsel %vm2707_vm14, %v2676_v11, %v2692_v33  ;;  %v2710_v45 = vsel %vm2707_vm14, %v2677_v0, %v2693_v22 }
 0x47d   :  { %v2724_v5 = vcombine.low %v2708_v40, %v2709_v27  ;;  %v2711_v62 = vsel %vm2707_vm14, %v2678_v44, %v2694_v24 }
 0x47e   :  { %v2725_v49 = vcombine.low %v2710_v45, %v2711_v62 }
 0x47f   :  { %v2732_v46 = vrot.slane %v2724_v5, %v2731_v41 }
 0x480   :  { %v2739_v59 = vrot.slane %v2725_v49, %v2731_v41 }
 0x482   :  { %v2740_v18 = vcombine.low %v2732_v46, %v2739_v59 }
 0x484   :  { %2760 = vst [vmem:[%s3843_s11] sm:$0xff] %v2740_v18 }
 0x4b6   :  { %v2609_v57 = vpop.f32.mrb[132].mxu0 }
 0x4b7   :  { %v2671_v60 = vadd.f32 %v2666_v14, %v2609_v57  ;;  %v2611_v9 = vpop.f32.mrb[133].mxu0  ;;  %v2650_v37 = vpop.f32.mrb[132].mxu1 }
 0x4b8   :  { %v2672_v58 = vadd.f32 %v2666_v14, %v2611_v9  ;;  %v2613_v20 = vpop.f32.mrb[134].mxu0  ;;  %v2673_v56 = vadd.f32 %v2666_v14, %v2650_v37  ;;  %v2652_v61 = vpop.f32.mrb[133].mxu1 }
 0x4b9   :  { %v2679_v16 = vmul.f32 %v3261_v6, %v2671_v60  ;;  %v2614_v36 = vpop.f32.mrb[135].mxu0  ;;  %v2674_v52 = vadd.f32 %v2666_v14, %v2652_v61  ;;  %v2654_v2 = vpop.f32.mrb[134].mxu1 }
 0x4ba   :  { %v2680_v54 = vmul.f32 %v3273_v1, %v2672_v58  ;;  %v2681_v4 = vmul.f32 %v3264_v10, %v2673_v56  ;;  %v2655_v8 = vpop.f32.mrb[135].mxu1 }
 0x4bb   :  { %v2712_v3 = vsel %vm2707_vm14, %v2679_v16, %v2695_v53  ;;  %v2682_v6 = vmul.f32 %v3276_v19, %v2674_v52 }
 0x4bc   :  { %v2713_v39 = vsel %vm2707_vm14, %v2680_v54, %v2696_v25  ;;  %v2714_v12 = vsel %vm2707_vm14, %v2681_v4, %v2697_v55 }
 0x4bd   :  { %v2741_v13 = vcombine.low %v2712_v3, %v2713_v39  ;;  %v2715_v1 = vsel %vm2707_vm14, %v2682_v6, %v2698_v29 }
 0x4be   :  { %v2742_v14 = vcombine.low %v2714_v12, %v2715_v1 }
 0x4bf   :  { %v2749_v50 = vrot.slane %v2741_v13, %v2731_v41 }
 0x4c0   :  { %v2756_v15 = vrot.slane %v2742_v14, %v2731_v41 }
 0x4c2   :  { %v2757_v17 = vcombine.low %v2749_v50, %v2756_v15 }
 0x4c4   :  { %2761 = vst [vmem:[%s3843_s11 + $0x8] sm:$0xff] %v2757_v17 }

</bundles_post_ra>
